<compile_context>
chip_gen: v5e
topology: v5e:2x2
jax: 0.10.0
libtpu: 0.0.40
codegen_flags: <defaults>
</compile_context>

<pallas_src>
import functools
import math

import jax
import jax.numpy as jnp
from jax.experimental import pallas as pl
from jax.experimental.pallas import tpu as pltpu


def _pick_tile(dim, align, cap):
    """Largest power-of-two multiple of `align` that divides `dim` (<= cap).
    Falls back to the full dim (full-extent blocks are always legal)."""
    if dim % align != 0:
        return dim
    best = align
    t = align
    while t <= min(dim, cap):
        if dim % t == 0:
            best = t
        t *= 2
    return best


def _pick_seq_tile(s, cap):
    """Sk tile: multiple of 128 dividing s (<= cap), else the full extent."""
    if s % 128 != 0:
        return s
    best = 128
    t = 128
    while t <= min(s, cap):
        if s % t == 0:
            best = t
        t *= 2
    return best


# ----------------------------- tiled linear --------------------------------

def _linear_kernel(x_ref, w_ref, b_ref, o_ref, acc_ref, *, activation):
    @pl.when(pl.program_id(2) == 0)
    def _():
        acc_ref[...] = jnp.zeros_like(acc_ref)

    acc_ref[...] += jnp.dot(x_ref[...], w_ref[...],
                            preferred_element_type=jnp.float32)

    @pl.when(pl.program_id(2) == pl.num_programs(2) - 1)
    def _():
        y = acc_ref[...] + b_ref[...]
        if activation == "relu":
            y = jnp.maximum(y, 0.0)
        o_ref[...] = y.astype(o_ref.dtype)


def linear(x2d, w, b, activation=None, out_dtype=jnp.bfloat16, tn_cap=1024):
    """x2d: [M, K] bf16, w: [K, N] bf16, b: [N] f32 -> [M, N] out_dtype.
    PyTorch Linear with the weight stored as [in, out]."""
    M, K = x2d.shape
    N = w.shape[1]
    tm = _pick_tile(M, 16, 512)       # 16: bf16 sublane packing
    tk = _pick_tile(K, 128, 1024)
    tn = _pick_tile(N, 128, tn_cap)
    grid = (M // tm, N // tn, K // tk)
    kern = functools.partial(_linear_kernel, activation=activation)
    return pl.pallas_call(
        kern,
        out_shape=jax.ShapeDtypeStruct((M, N), out_dtype),
        grid=grid,
        in_specs=[
            pl.BlockSpec((tm, tk), lambda i, j, k: (i, k)),
            pl.BlockSpec((tk, tn), lambda i, j, k: (k, j)),
            pl.BlockSpec((1, tn), lambda i, j, k: (0, j)),
        ],
        out_specs=pl.BlockSpec((tm, tn), lambda i, j, k: (i, j)),
        scratch_shapes=[pltpu.VMEM((tm, tn), jnp.float32)],
        compiler_params=pltpu.CompilerParams(
            dimension_semantics=("parallel", "parallel", "arbitrary"),
            vmem_limit_bytes=48 * 1024 * 1024),   # worst-case tiles ~11 MiB
    )(x2d.astype(jnp.bfloat16), w.astype(jnp.bfloat16),
      b.astype(jnp.float32).reshape(1, N))


# ------------------------ fused residual + LayerNorm ------------------------

def _add_layernorm_kernel(x_ref, r_ref, g_ref, b_ref, o_ref, *, eps):
    x = x_ref[...].astype(jnp.float32) + r_ref[...].astype(jnp.float32)
    mu = jnp.mean(x, axis=-1, keepdims=True)
    var = jnp.mean((x - mu) * (x - mu), axis=-1, keepdims=True)
    y = (x - mu) * jax.lax.rsqrt(var + eps) * g_ref[...] + b_ref[...]
    o_ref[...] = y.astype(o_ref.dtype)


def add_layer_norm(x, res, gamma, beta, eps=1e-5):
    """LayerNorm(x + res) over the last dim. x, res: [B, S, D] bf16 -> bf16."""
    B, S, D = x.shape
    M = B * S
    tm = _pick_tile(M, 16, 512)
    kern = functools.partial(_add_layernorm_kernel, eps=eps)
    out = pl.pallas_call(
        kern,
        out_shape=jax.ShapeDtypeStruct((M, D), jnp.bfloat16),
        grid=(M // tm,),
        in_specs=[
            pl.BlockSpec((tm, D), lambda i: (i, 0)),
            pl.BlockSpec((tm, D), lambda i: (i, 0)),
            pl.BlockSpec((1, D), lambda i: (0, 0)),   # gamma resident
            pl.BlockSpec((1, D), lambda i: (0, 0)),   # beta resident
        ],
        out_specs=pl.BlockSpec((tm, D), lambda i: (i, 0)),
        compiler_params=pltpu.CompilerParams(dimension_semantics=("parallel",)),
    )(x.reshape(M, D).astype(jnp.bfloat16), res.reshape(M, D).astype(jnp.bfloat16),
      gamma.astype(jnp.float32).reshape(1, D), beta.astype(jnp.float32).reshape(1, D))
    return out.reshape(B, S, D)


# ---------------------- flash-style attention kernel ------------------------

def _flash_attn_kernel(q_ref, k_ref, v_ref, *rest, scale, num_heads, has_mask):
    if has_mask:
        bias_ref, o_ref, m_ref, l_ref, acc_ref = rest
    else:
        o_ref, m_ref, l_ref, acc_ref = rest

    ki = pl.program_id(2)

    @pl.when(ki == 0)
    def _():
        m_ref[...] = jnp.full_like(m_ref, -jnp.inf)
        l_ref[...] = jnp.zeros_like(l_ref)
        acc_ref[...] = jnp.zeros_like(acc_ref)

    q = q_ref[0] * scale          # [H, tq, Dh] bf16 — scale folded into q
    k = k_ref[0]                  # [H, tk, Dh] bf16
    v = v_ref[0]                  # [H, tk, Dh] bf16

    # batched QK^T (contract on Dh, batch on heads) -> [H, tq, tk] f32
    s = jax.lax.dot_general(
        q, k, dimension_numbers=(((2,), (2,)), ((0,), (0,))),
        preferred_element_type=jnp.float32)
    if has_mask:
        s = s + bias_ref[...][None, :, :]          # additive bias (0 / -1e9)

    m_prev = m_ref[...]
    m_new = jnp.maximum(m_prev, jnp.max(s, axis=-1, keepdims=True))
    alpha = jnp.exp(m_prev - m_new)
    p = jnp.exp(s - m_new)
    l_ref[...] = alpha * l_ref[...] + jnp.sum(p, axis=-1, keepdims=True)
    acc_ref[...] = alpha * acc_ref[...] + jax.lax.dot_general(
        p.astype(v.dtype), v, dimension_numbers=(((2,), (1,)), ((0,), (0,))),
        preferred_element_type=jnp.float32)        # [H, tq, Dh]
    m_ref[...] = m_new

    @pl.when(ki == pl.num_programs(2) - 1)
    def _():
        ctx = acc_ref[...] * pl.reciprocal(l_ref[...], approx=True)   # EUP recip
        # merge heads into a lane-dense [tq, H*Dh] slab (one wide store)
        o_ref[0] = jnp.concatenate(
            [ctx[h] for h in range(num_heads)], axis=-1).astype(o_ref.dtype)


def sdpa(q, k, v, bias, scale):
    """q: [B, H, Sq, Dh], k/v: [B, H, Sk, Dh], bias: [Sq, Sk] f32 or None
    -> [B, Sq, H*Dh] bf16.  Online-softmax over Sk tiles."""
    B, H, Sq, Dh = q.shape
    Sk = k.shape[2]
    D = H * Dh
    tq = _pick_tile(Sq, 8, 256)
    tk = _pick_seq_tile(Sk, 512)
    has_mask = bias is not None
    grid = (B, Sq // tq, Sk // tk)

    kern = functools.partial(_flash_attn_kernel, scale=scale,
                             num_heads=H, has_mask=has_mask)
    in_specs = [
        pl.BlockSpec((1, H, tq, Dh), lambda b, qi, ki: (b, 0, qi, 0)),
        pl.BlockSpec((1, H, tk, Dh), lambda b, qi, ki: (b, 0, ki, 0)),
        pl.BlockSpec((1, H, tk, Dh), lambda b, qi, ki: (b, 0, ki, 0)),
    ]
    args = [q.astype(jnp.bfloat16), k.astype(jnp.bfloat16), v.astype(jnp.bfloat16)]
    if has_mask:
        in_specs.append(pl.BlockSpec((tq, tk), lambda b, qi, ki: (qi, ki)))
        args.append(bias.astype(jnp.float32))

    return pl.pallas_call(
        kern,
        out_shape=jax.ShapeDtypeStruct((B, Sq, D), jnp.bfloat16),
        grid=grid,
        in_specs=in_specs,
        out_specs=pl.BlockSpec((1, tq, D), lambda b, qi, ki: (b, qi, 0)),
        scratch_shapes=[pltpu.VMEM((H, tq, 1), jnp.float32),   # running max
                        pltpu.VMEM((H, tq, 1), jnp.float32),   # running denom
                        pltpu.VMEM((H, tq, Dh), jnp.float32)], # running acc
        compiler_params=pltpu.CompilerParams(
            dimension_semantics=("parallel", "parallel", "arbitrary"),
            vmem_limit_bytes=48 * 1024 * 1024),
    )(*args)


# ----------------------------- model glue (plain JAX) ----------------------

def positional_encoding(max_len, d_model):
    pos = jnp.arange(max_len, dtype=jnp.float32)[:, None]
    i = jnp.arange(0, d_model, 2, dtype=jnp.float32)[None, :]
    div = jnp.exp(-math.log(10000.0) * i / d_model)
    pe = jnp.zeros((max_len, d_model), jnp.float32)
    pe = pe.at[:, 0::2].set(jnp.sin(pos * div))
    pe = pe.at[:, 1::2].set(jnp.cos(pos * div))
    return pe


def multi_head_attention(x_q, x_kv, p, mask, num_heads, *, self_attention):
    """x_q: [B, Sq, D], x_kv: [B, Sk, D] (bf16), mask: [Sq, Sk] (1=attend) or None."""
    B, Sq, D = x_q.shape
    Sk = x_kv.shape[1]
    Dh = D // num_heads

    if self_attention:
        # fused QKV projection: one [D, 3D] matmul
        qkv = linear(x_q.reshape(B * Sq, D), p["wqkv"], p["bqkv"])
        qkv = qkv.reshape(B, Sq, 3, num_heads, Dh)
        q, k, v = qkv[:, :, 0], qkv[:, :, 1], qkv[:, :, 2]       # [B, S, H, Dh]
    else:
        q = linear(x_q.reshape(B * Sq, D), p["wq"], p["bq"]).reshape(
            B, Sq, num_heads, Dh)
        kv = linear(x_kv.reshape(B * Sk, D), p["wkv"], p["bkv"]).reshape(
            B, Sk, 2, num_heads, Dh)
        k, v = kv[:, :, 0], kv[:, :, 1]

    # TODO(synk): head-split relayout stays in XLA (bf16) — per-head Dh=16 lane
    # blocks would violate the (8,128) BlockSpec rule, so the attention kernel
    # keeps all heads resident per grid step.
    q = q.transpose(0, 2, 1, 3)      # [B, H, Sq, Dh]
    k = k.transpose(0, 2, 1, 3)      # [B, H, Sk, Dh]
    v = v.transpose(0, 2, 1, 3)      # [B, H, Sk, Dh]

    bias = None
    if mask is not None:
        # 1.0=attend -> additive bias (0 attend, -1e9 masked), precomputed once.
        bias = (mask.astype(jnp.float32) - 1.0) * 1e9

    ctx = sdpa(q, k, v, bias, scale=1.0 / math.sqrt(Dh))         # [B, Sq, D] bf16
    out = linear(ctx.reshape(B * Sq, D), p["wo"], p["bo"]).reshape(B, Sq, D)
    return out


def feed_forward(x, p):
    B, S, D = x.shape
    h = linear(x.reshape(B * S, D), p["w1"], p["b1"], activation="relu")
    o = linear(h, p["w2"], p["b2"])
    return o.reshape(B, S, D)


def encoder_block(x, p, mask, num_heads):
    a = multi_head_attention(x, x, p["attn"], mask, num_heads, self_attention=True)
    x = add_layer_norm(x, a, p["ln1_g"], p["ln1_b"])
    f = feed_forward(x, p["ffn"])
    x = add_layer_norm(x, f, p["ln2_g"], p["ln2_b"])
    return x


def decoder_block(x, enc, p, tgt_mask, src_mask, num_heads):
    a = multi_head_attention(x, x, p["self_attn"], tgt_mask, num_heads,
                             self_attention=True)
    x = add_layer_norm(x, a, p["ln1_g"], p["ln1_b"])
    c = multi_head_attention(x, enc, p["cross_attn"], src_mask, num_heads,
                             self_attention=False)
    x = add_layer_norm(x, c, p["ln2_g"], p["ln2_b"])
    f = feed_forward(x, p["ffn"])
    x = add_layer_norm(x, f, p["ln3_g"], p["ln3_b"])
    return x


def transformer_forward(params, src_ids, tgt_ids, src_mask=None, tgt_mask=None,
                        num_heads=4, tgt_vocab=None):
    # dropout = 0.0 -> identity
    D = params["src_emb"].shape[1]
    pe = params["pe"]

    # TODO(synk): embedding gather stays in XLA (jnp.take); no clean Pallas win.
    src = (jnp.take(params["src_emb"], src_ids, axis=0)
           + pe[: src_ids.shape[1]][None]).astype(jnp.bfloat16)
    tgt = (jnp.take(params["tgt_emb"], tgt_ids, axis=0)
           + pe[: tgt_ids.shape[1]][None]).astype(jnp.bfloat16)

    for lp in params["enc_layers"]:
        src = encoder_block(src, lp, src_mask, num_heads)
    enc_output = src

    for lp in params["dec_layers"]:
        tgt = decoder_block(tgt, enc_output, lp, tgt_mask, src_mask, num_heads)

    B, S, _ = tgt.shape
    # fc_w/fc_b are stored padded to a multiple of 128 lanes (lane-dense stores);
    # logits are produced in f32 and sliced back to the true vocab at the end.
    logits = linear(tgt.reshape(B * S, D), params["fc_w"], params["fc_b"],
                    out_dtype=jnp.float32, tn_cap=2048)
    logits = logits.reshape(B, S, -1)
    if tgt_vocab is not None:
        logits = logits[:, :, :tgt_vocab]
    return logits


# ----------------------------- parameter init ------------------------------

def _dense_init(key, fan_in, fan_out):
    kw, kb = jax.random.split(key)
    w = (jax.random.normal(kw, (fan_in, fan_out), jnp.float32) * 0.02).astype(
        jnp.bfloat16)                               # bf16 weight storage (MXU path)
    b = jax.random.normal(kb, (fan_out,), jnp.float32) * 0.02
    return w, b


def _self_attn_params(key, d):
    k1, k2 = jax.random.split(key)
    wqkv, bqkv = _dense_init(k1, d, 3 * d)          # fused Q|K|V
    wo, bo = _dense_init(k2, d, d)
    return dict(wqkv=wqkv, bqkv=bqkv, wo=wo, bo=bo)


def _cross_attn_params(key, d):
    k1, k2, k3 = jax.random.split(key, 3)
    wq, bq = _dense_init(k1, d, d)
    wkv, bkv = _dense_init(k2, d, 2 * d)            # fused K|V
    wo, bo = _dense_init(k3, d, d)
    return dict(wq=wq, bq=bq, wkv=wkv, bkv=bkv, wo=wo, bo=bo)


def _ffn_params(key, d, f):
    k1, k2 = jax.random.split(key)
    w1, b1 = _dense_init(k1, d, f)
    w2, b2 = _dense_init(k2, f, d)
    return dict(w1=w1, b1=b1, w2=w2, b2=b2)


def init_transformer(key, src_vocab, tgt_vocab, d, num_heads, f, num_layers, max_len):
    keys = jax.random.split(key, 4 + 2 * num_layers)
    params = {}
    params["src_emb"] = jax.random.normal(keys[0], (src_vocab, d), jnp.float32)
    params["tgt_emb"] = jax.random.normal(keys[1], (tgt_vocab, d), jnp.float32)
    params["pe"] = positional_encoding(max_len, d)

    enc_layers = []
    for i in range(num_layers):
        k = jax.random.split(keys[2 + i], 2)
        enc_layers.append(dict(
            attn=_self_attn_params(k[0], d),
            ffn=_ffn_params(k[1], d, f),
            ln1_g=jnp.ones((d,), jnp.float32), ln1_b=jnp.zeros((d,), jnp.float32),
            ln2_g=jnp.ones((d,), jnp.float32), ln2_b=jnp.zeros((d,), jnp.float32),
        ))
    params["enc_layers"] = enc_layers

    dec_layers = []
    for i in range(num_layers):
        k = jax.random.split(keys[2 + num_layers + i], 3)
        dec_layers.append(dict(
            self_attn=_self_attn_params(k[0], d),
            cross_attn=_cross_attn_params(k[1], d),
            ffn=_ffn_params(k[2], d, f),
            ln1_g=jnp.ones((d,), jnp.float32), ln1_b=jnp.zeros((d,), jnp.float32),
            ln2_g=jnp.ones((d,), jnp.float32), ln2_b=jnp.zeros((d,), jnp.float32),
            ln3_g=jnp.ones((d,), jnp.float32), ln3_b=jnp.zeros((d,), jnp.float32),
        ))
    params["dec_layers"] = dec_layers

    fc_w, fc_b = _dense_init(keys[2 + 2 * num_layers], d, tgt_vocab)
    pad = (-tgt_vocab) % 128                        # lane-dense vocab projection
    params["fc_w"] = jnp.pad(fc_w, ((0, 0), (0, pad)))
    params["fc_b"] = jnp.pad(fc_b, ((0, pad),))
    return params


# ----------------------------- main ----------------------------------------

if __name__ == "__main__":
    # Small shapes consistent with the module defaults (scaled down).
    SRC_VOCAB, TGT_VOCAB = 17, 19
    EMBED_DIM, NUM_HEADS, FF_DIM, NUM_LAYERS, MAX_LEN = 64, 4, 256, 2, 32
    B, S = 2, 8

    key = jax.random.PRNGKey(0)
    kp, ks, kt = jax.random.split(key, 3)

    params = init_transformer(kp, SRC_VOCAB, TGT_VOCAB, EMBED_DIM, NUM_HEADS,
                              FF_DIM, NUM_LAYERS, MAX_LEN)

    src_ids = jax.random.randint(ks, (B, S), 0, SRC_VOCAB, dtype=jnp.int32)
    tgt_ids = jax.random.randint(kt, (B, S), 0, TGT_VOCAB, dtype=jnp.int32)

    # src_mask = None (no masking); tgt_mask = causal (lower-triangular of ones,
    # 1.0 = attend — opposite of PyTorch's attn_mask True=disallowed convention).
    tgt_mask = jnp.tril(jnp.ones((S, S), jnp.float32))

    fwd = jax.jit(functools.partial(transformer_forward,
                                    num_heads=NUM_HEADS, tgt_vocab=TGT_VOCAB))
    out = fwd(params, src_ids, tgt_ids, None, tgt_mask)
    out = jax.block_until_ready(out)

    assert out.shape == (B, S, TGT_VOCAB), out.shape
    assert jnp.all(jnp.isfinite(out))
    print("KERNEL_OK")
</pallas_src>

<mosaic_0001>
module attributes {stable_mosaic.version = 11 : i64} {
  func.func @_linear_kernel(%arg0: i32, %arg1: i32, %arg2: i32, %arg3: memref<16x64xbf16, #tpu.memory_space<vmem>>, %arg4: memref<64x64xbf16, #tpu.memory_space<vmem>>, %arg5: memref<1x64xf32, #tpu.memory_space<vmem>>, %arg6: memref<16x64xbf16, #tpu.memory_space<vmem>>, %arg7: memref<16x64xf32, #tpu.memory_space<vmem>>) attributes {dimension_semantics = [#tpu.dimension_semantics<parallel>, #tpu.dimension_semantics<parallel>, #tpu.dimension_semantics<arbitrary>], iteration_bounds = array<i64: 1, 1, 1>, scalar_prefetch = 0 : i64, scratch_operands = 1 : i64, tpu.core_type = #tpu.core_type<tc>, window_params = [{transform_indices = @transform_0, window_bounds = array<i64: 16, 64>}, {transform_indices = @transform_1, window_bounds = array<i64: 64, 64>}, {transform_indices = @transform_2, window_bounds = array<i64: 1, 64>}, {transform_indices = @transform_3, window_bounds = array<i64: 16, 64>}]} {
    %c0_i32 = arith.constant 0 : i32
    %0 = arith.cmpi eq, %arg2, %c0_i32 : i32
    %1 = arith.extui %0 : i1 to i32
    %c0_i32_0 = arith.constant 0 : i32
    %2 = arith.cmpi ne, %1, %c0_i32_0 : i32
    scf.if %2 {
      %cst_10 = arith.constant 0.000000e+00 : f32
      %12 = vector.broadcast %cst_10 : f32 to vector<16x64xf32>
      %c0_11 = arith.constant 0 : index
      %c0_12 = arith.constant 0 : index
      %13 = vector.load %arg7[%c0_11, %c0_12] : memref<16x64xf32, #tpu.memory_space<vmem>>, vector<16x64xf32>
      tpu.vector_store %arg7[%c0_11, %c0_12], %12 {strides = array<i32>} : memref<16x64xf32, #tpu.memory_space<vmem>>, vector<16x64xf32>,
    } else {
    }
    %c0 = arith.constant 0 : index
    %c0_1 = arith.constant 0 : index
    %3 = vector.load %arg7[%c0, %c0_1] : memref<16x64xf32, #tpu.memory_space<vmem>>, vector<16x64xf32>
    %c0_2 = arith.constant 0 : index
    %c0_3 = arith.constant 0 : index
    %4 = vector.load %arg3[%c0_2, %c0_3] : memref<16x64xbf16, #tpu.memory_space<vmem>>, vector<16x64xbf16>
    %c0_4 = arith.constant 0 : index
    %c0_5 = arith.constant 0 : index
    %5 = vector.load %arg4[%c0_4, %c0_5] : memref<64x64xbf16, #tpu.memory_space<vmem>>, vector<64x64xbf16>
    %cst = arith.constant dense<0.000000e+00> : vector<16x64xf32>
    %6 = tpu.matmul %4, %5, %cst {dimension_numbers = #tpu.dot_dimension_numbers<[1], [0], [0], [1], [0, 0, 1, 1], [], []>} : vector<16x64xbf16>, vector<64x64xbf16>, vector<16x64xf32> -> vector<16x64xf32>
    %7 = arith.addf %3, %6 : vector<16x64xf32>
    %c0_6 = arith.constant 0 : index
    %c0_7 = arith.constant 0 : index
    %8 = vector.load %arg7[%c0_6, %c0_7] : memref<16x64xf32, #tpu.memory_space<vmem>>, vector<16x64xf32>
    tpu.vector_store %arg7[%c0_6, %c0_7], %7 {strides = array<i32>} : memref<16x64xf32, #tpu.memory_space<vmem>>, vector<16x64xf32>,
    %c0_i32_8 = arith.constant 0 : i32
    %9 = arith.cmpi eq, %arg2, %c0_i32_8 : i32
    %10 = arith.extui %9 : i1 to i32
    %c0_i32_9 = arith.constant 0 : i32
    %11 = arith.cmpi ne, %10, %c0_i32_9 : i32
    scf.if %11 {
      %c0_10 = arith.constant 0 : index
      %c0_11 = arith.constant 0 : index
      %12 = vector.load %arg7[%c0_10, %c0_11] : memref<16x64xf32, #tpu.memory_space<vmem>>, vector<16x64xf32>
      %c0_12 = arith.constant 0 : index
      %c0_13 = arith.constant 0 : index
      %13 = vector.load %arg5[%c0_12, %c0_13] : memref<1x64xf32, #tpu.memory_space<vmem>>, vector<1x64xf32>
      %14 = vector.broadcast %13 : vector<1x64xf32> to vector<16x64xf32>
      %15 = arith.addf %12, %14 : vector<16x64xf32>
      %16 = arith.truncf %15 : vector<16x64xf32> to vector<16x64xbf16>
      %c0_14 = arith.constant 0 : index
      %c0_15 = arith.constant 0 : index
      %17 = vector.load %arg6[%c0_14, %c0_15] : memref<16x64xbf16, #tpu.memory_space<vmem>>, vector<16x64xbf16>
      tpu.vector_store %arg6[%c0_14, %c0_15], %16 {strides = array<i32>} : memref<16x64xbf16, #tpu.memory_space<vmem>>, vector<16x64xbf16>,
    } else {
    }
    return
  }
  func.func @transform_0(%arg0: i32, %arg1: i32, %arg2: i32) -> (i32, i32) {
    %c0_i32 = arith.constant 0 : i32
    return %arg0, %arg2 : i32, i32
  }
  func.func @transform_1(%arg0: i32, %arg1: i32, %arg2: i32) -> (i32, i32) {
    %c0_i32 = arith.constant 0 : i32
    return %arg2, %arg1 : i32, i32
  }
  func.func @transform_2(%arg0: i32, %arg1: i32, %arg2: i32) -> (i32, i32) {
    %c0_i32 = arith.constant 0 : i32
    %c0_i32_0 = arith.constant 0 : i32
    return %c0_i32, %arg1 : i32, i32
  }
  func.func @transform_3(%arg0: i32, %arg1: i32, %arg2: i32) -> (i32, i32) {
    %c0_i32 = arith.constant 0 : i32
    return %arg0, %arg1 : i32, i32
  }
}

module attributes {stable_mosaic.version = 11 : i64} {
  func.func @_linear_kernel(%arg0: i32, %arg1: i32, %arg2: i32, %arg3: memref<16x64xbf16, #tpu.memory_space<vmem>>, %arg4: memref<64x192xbf16, #tpu.memory_space<vmem>>, %arg5: memref<1x192xf32, #tpu.memory_space<vmem>>, %arg6: memref<16x192xbf16, #tpu.memory_space<vmem>>, %arg7: memref<16x192xf32, #tpu.memory_space<vmem>>) attributes {dimension_semantics = [#tpu.dimension_semantics<parallel>, #tpu.dimension_semantics<parallel>, #tpu.dimension_semantics<arbitrary>], iteration_bounds = array<i64: 1, 1, 1>, scalar_prefetch = 0 : i64, scratch_operands = 1 : i64, tpu.core_type = #tpu.core_type<tc>, window_params = [{transform_indices = @transform_0, window_bounds = array<i64: 16, 64>}, {transform_indices = @transform_1, window_bounds = array<i64: 64, 192>}, {transform_indices = @transform_2, window_bounds = array<i64: 1, 192>}, {transform_indices = @transform_3, window_bounds = array<i64: 16, 192>}]} {
    %c0_i32 = arith.constant 0 : i32
    %0 = arith.cmpi eq, %arg2, %c0_i32 : i32
    %1 = arith.extui %0 : i1 to i32
    %c0_i32_0 = arith.constant 0 : i32
    %2 = arith.cmpi ne, %1, %c0_i32_0 : i32
    scf.if %2 {
      %cst_10 = arith.constant 0.000000e+00 : f32
      %12 = vector.broadcast %cst_10 : f32 to vector<16x192xf32>
      %c0_11 = arith.constant 0 : index
      %c0_12 = arith.constant 0 : index
      %13 = vector.load %arg7[%c0_11, %c0_12] : memref<16x192xf32, #tpu.memory_space<vmem>>, vector<16x192xf32>
      tpu.vector_store %arg7[%c0_11, %c0_12], %12 {strides = array<i32>} : memref<16x192xf32, #tpu.memory_space<vmem>>, vector<16x192xf32>,
    } else {
    }
    %c0 = arith.constant 0 : index
    %c0_1 = arith.constant 0 : index
    %3 = vector.load %arg7[%c0, %c0_1] : memref<16x192xf32, #tpu.memory_space<vmem>>, vector<16x192xf32>
    %c0_2 = arith.constant 0 : index
    %c0_3 = arith.constant 0 : index
    %4 = vector.load %arg3[%c0_2, %c0_3] : memref<16x64xbf16, #tpu.memory_space<vmem>>, vector<16x64xbf16>
    %c0_4 = arith.constant 0 : index
    %c0_5 = arith.constant 0 : index
    %5 = vector.load %arg4[%c0_4, %c0_5] : memref<64x192xbf16, #tpu.memory_space<vmem>>, vector<64x192xbf16>
    %cst = arith.constant dense<0.000000e+00> : vector<16x192xf32>
    %6 = tpu.matmul %4, %5, %cst {dimension_numbers = #tpu.dot_dimension_numbers<[1], [0], [0], [1], [0, 0, 1, 1], [], []>} : vector<16x64xbf16>, vector<64x192xbf16>, vector<16x192xf32> -> vector<16x192xf32>
    %7 = arith.addf %3, %6 : vector<16x192xf32>
    %c0_6 = arith.constant 0 : index
    %c0_7 = arith.constant 0 : index
    %8 = vector.load %arg7[%c0_6, %c0_7] : memref<16x192xf32, #tpu.memory_space<vmem>>, vector<16x192xf32>
    tpu.vector_store %arg7[%c0_6, %c0_7], %7 {strides = array<i32>} : memref<16x192xf32, #tpu.memory_space<vmem>>, vector<16x192xf32>,
    %c0_i32_8 = arith.constant 0 : i32
    %9 = arith.cmpi eq, %arg2, %c0_i32_8 : i32
    %10 = arith.extui %9 : i1 to i32
    %c0_i32_9 = arith.constant 0 : i32
    %11 = arith.cmpi ne, %10, %c0_i32_9 : i32
    scf.if %11 {
      %c0_10 = arith.constant 0 : index
      %c0_11 = arith.constant 0 : index
      %12 = vector.load %arg7[%c0_10, %c0_11] : memref<16x192xf32, #tpu.memory_space<vmem>>, vector<16x192xf32>
      %c0_12 = arith.constant 0 : index
      %c0_13 = arith.constant 0 : index
      %13 = vector.load %arg5[%c0_12, %c0_13] : memref<1x192xf32, #tpu.memory_space<vmem>>, vector<1x192xf32>
      %14 = vector.broadcast %13 : vector<1x192xf32> to vector<16x192xf32>
      %15 = arith.addf %12, %14 : vector<16x192xf32>
      %16 = arith.truncf %15 : vector<16x192xf32> to vector<16x192xbf16>
      %c0_14 = arith.constant 0 : index
      %c0_15 = arith.constant 0 : index
      %17 = vector.load %arg6[%c0_14, %c0_15] : memref<16x192xbf16, #tpu.memory_space<vmem>>, vector<16x192xbf16>
      tpu.vector_store %arg6[%c0_14, %c0_15], %16 {strides = array<i32>} : memref<16x192xbf16, #tpu.memory_space<vmem>>, vector<16x192xbf16>,
    } else {
    }
    return
  }
  func.func @transform_0(%arg0: i32, %arg1: i32, %arg2: i32) -> (i32, i32) {
    %c0_i32 = arith.constant 0 : i32
    return %arg0, %arg2 : i32, i32
  }
  func.func @transform_1(%arg0: i32, %arg1: i32, %arg2: i32) -> (i32, i32) {
    %c0_i32 = arith.constant 0 : i32
    return %arg2, %arg1 : i32, i32
  }
  func.func @transform_2(%arg0: i32, %arg1: i32, %arg2: i32) -> (i32, i32) {
    %c0_i32 = arith.constant 0 : i32
    %c0_i32_0 = arith.constant 0 : i32
    return %c0_i32, %arg1 : i32, i32
  }
  func.func @transform_3(%arg0: i32, %arg1: i32, %arg2: i32) -> (i32, i32) {
    %c0_i32 = arith.constant 0 : i32
    return %arg0, %arg1 : i32, i32
  }
}

module attributes {stable_mosaic.version = 11 : i64} {
  func.func @_flash_attn_kernel(%arg0: i32, %arg1: i32, %arg2: i32, %arg3: memref<1x4x8x16xbf16, #tpu.memory_space<vmem>>, %arg4: memref<1x4x8x16xbf16, #tpu.memory_space<vmem>>, %arg5: memref<1x4x8x16xbf16, #tpu.memory_space<vmem>>, %arg6: memref<8x8xf32, #tpu.memory_space<vmem>>, %arg7: memref<1x8x64xbf16, #tpu.memory_space<vmem>>, %arg8: memref<4x8x1xf32, #tpu.memory_space<vmem>>, %arg9: memref<4x8x1xf32, #tpu.memory_space<vmem>>, %arg10: memref<4x8x16xf32, #tpu.memory_space<vmem>>) attributes {dimension_semantics = [#tpu.dimension_semantics<parallel>, #tpu.dimension_semantics<parallel>, #tpu.dimension_semantics<arbitrary>], iteration_bounds = array<i64: 2, 1, 1>, scalar_prefetch = 0 : i64, scratch_operands = 3 : i64, tpu.core_type = #tpu.core_type<tc>, window_params = [{transform_indices = @transform_0, window_bounds = array<i64: 1, 4, 8, 16>}, {transform_indices = @transform_1, window_bounds = array<i64: 1, 4, 8, 16>}, {transform_indices = @transform_2, window_bounds = array<i64: 1, 4, 8, 16>}, {transform_indices = @transform_3, window_bounds = array<i64: 8, 8>}, {transform_indices = @transform_4, window_bounds = array<i64: 1, 8, 64>}]} {
    %c0_i32 = arith.constant 0 : i32
    %0 = arith.cmpi eq, %arg2, %c0_i32 : i32
    %1 = arith.extui %0 : i1 to i32
    %c0_i32_0 = arith.constant 0 : i32
    %2 = arith.cmpi ne, %1, %c0_i32_0 : i32
    scf.if %2 {
      %cst_38 = arith.constant 0xFF800000 : f32
      %42 = vector.broadcast %cst_38 : f32 to vector<4x8x1xf32>
      %c0_39 = arith.constant 0 : index
      %c0_40 = arith.constant 0 : index
      %c0_41 = arith.constant 0 : index
      %43 = vector.load %arg8[%c0_39, %c0_40, %c0_41] : memref<4x8x1xf32, #tpu.memory_space<vmem>>, vector<4x8x1xf32>
      tpu.vector_store %arg8[%c0_39, %c0_40, %c0_41], %42 {strides = array<i32>} : memref<4x8x1xf32, #tpu.memory_space<vmem>>, vector<4x8x1xf32>,
      %cst_42 = arith.constant 0.000000e+00 : f32
      %44 = vector.broadcast %cst_42 : f32 to vector<4x8x1xf32>
      %c0_43 = arith.constant 0 : index
      %c0_44 = arith.constant 0 : index
      %c0_45 = arith.constant 0 : index
      %45 = vector.load %arg9[%c0_43, %c0_44, %c0_45] : memref<4x8x1xf32, #tpu.memory_space<vmem>>, vector<4x8x1xf32>
      tpu.vector_store %arg9[%c0_43, %c0_44, %c0_45], %44 {strides = array<i32>} : memref<4x8x1xf32, #tpu.memory_space<vmem>>, vector<4x8x1xf32>,
      %cst_46 = arith.constant 0.000000e+00 : f32
      %46 = vector.broadcast %cst_46 : f32 to vector<4x8x16xf32>
      %c0_47 = arith.constant 0 : index
      %c0_48 = arith.constant 0 : index
      %c0_49 = arith.constant 0 : index
      %47 = vector.load %arg10[%c0_47, %c0_48, %c0_49] : memref<4x8x16xf32, #tpu.memory_space<vmem>>, vector<4x8x16xf32>
      tpu.vector_store %arg10[%c0_47, %c0_48, %c0_49], %46 {strides = array<i32>} : memref<4x8x16xf32, #tpu.memory_space<vmem>>, vector<4x8x16xf32>,
    } else {
    }
    %c0 = arith.constant 0 : index
    %c0_1 = arith.constant 0 : index
    %c0_2 = arith.constant 0 : index
    %c0_3 = arith.constant 0 : index
    %3 = vector.load %arg3[%c0, %c0_1, %c0_2, %c0_3] : memref<1x4x8x16xbf16, #tpu.memory_space<vmem>>, vector<1x4x8x16xbf16>
    %4 = vector.shape_cast %3 : vector<1x4x8x16xbf16> to vector<4x8x16xbf16>
    %cst = arith.constant 2.500000e-01 : bf16
    %5 = vector.broadcast %cst : bf16 to vector<4x8x16xbf16>
    %6 = arith.mulf %4, %5 : vector<4x8x16xbf16>
    %c0_4 = arith.constant 0 : index
    %c0_5 = arith.constant 0 : index
    %c0_6 = arith.constant 0 : index
    %c0_7 = arith.constant 0 : index
    %7 = vector.load %arg4[%c0_4, %c0_5, %c0_6, %c0_7] : memref<1x4x8x16xbf16, #tpu.memory_space<vmem>>, vector<1x4x8x16xbf16>
    %8 = vector.shape_cast %7 : vector<1x4x8x16xbf16> to vector<4x8x16xbf16>
    %c0_8 = arith.constant 0 : index
    %c0_9 = arith.constant 0 : index
    %c0_10 = arith.constant 0 : index
    %c0_11 = arith.constant 0 : index
    %9 = vector.load %arg5[%c0_8, %c0_9, %c0_10, %c0_11] : memref<1x4x8x16xbf16, #tpu.memory_space<vmem>>, vector<1x4x8x16xbf16>
    %10 = vector.shape_cast %9 : vector<1x4x8x16xbf16> to vector<4x8x16xbf16>
    %cst_12 = arith.constant dense<0.000000e+00> : vector<4x8x8xf32>
    %11 = tpu.matmul %6, %8, %cst_12 {dimension_numbers = #tpu.dot_dimension_numbers<[2], [2], [1], [1], [0, 0, 0, 1, 1, 1], [0], [0]>} : vector<4x8x16xbf16>, vector<4x8x16xbf16>, vector<4x8x8xf32> -> vector<4x8x8xf32>
    %c0_13 = arith.constant 0 : index
    %c0_14 = arith.constant 0 : index
    %12 = vector.load %arg6[%c0_13, %c0_14] : memref<8x8xf32, #tpu.memory_space<vmem>>, vector<8x8xf32>
    %13 = vector.shape_cast %12 : vector<8x8xf32> to vector<1x8x8xf32>
    %14 = vector.broadcast %13 : vector<1x8x8xf32> to vector<4x8x8xf32>
    %15 = arith.addf %11, %14 : vector<4x8x8xf32>
    %c0_15 = arith.constant 0 : index
    %c0_16 = arith.constant 0 : index
    %c0_17 = arith.constant 0 : index
    %16 = vector.load %arg8[%c0_15, %c0_16, %c0_17] : memref<4x8x1xf32, #tpu.memory_space<vmem>>, vector<4x8x1xf32>
    %cst_18 = arith.constant dense<0xFF800000> : vector<4x8xf32>
    %17 = vector.multi_reduction <maximumf>, %15, %cst_18 [2] : vector<4x8x8xf32> to vector<4x8xf32>
    %18 = vector.shape_cast %17 : vector<4x8xf32> to vector<4x8x1xf32>
    %19 = arith.maximumf %16, %18 : vector<4x8x1xf32>
    %20 = arith.subf %16, %19 : vector<4x8x1xf32>
    %21 = math.exp %20 : vector<4x8x1xf32>
    %22 = vector.broadcast %19 : vector<4x8x1xf32> to vector<4x8x8xf32>
    %23 = arith.subf %15, %22 : vector<4x8x8xf32>
    %24 = math.exp %23 : vector<4x8x8xf32>
    %c0_19 = arith.constant 0 : index
    %c0_20 = arith.constant 0 : index
    %c0_21 = arith.constant 0 : index
    %25 = vector.load %arg9[%c0_19, %c0_20, %c0_21] : memref<4x8x1xf32, #tpu.memory_space<vmem>>, vector<4x8x1xf32>
    %26 = arith.mulf %21, %25 : vector<4x8x1xf32>
    %cst_22 = arith.constant dense<0.000000e+00> : vector<4x8xf32>
    %27 = vector.multi_reduction <add>, %24, %cst_22 [2] : vector<4x8x8xf32> to vector<4x8xf32>
    %28 = vector.shape_cast %27 : vector<4x8xf32> to vector<4x8x1xf32>
    %29 = arith.addf %26, %28 : vector<4x8x1xf32>
    %c0_23 = arith.constant 0 : index
    %c0_24 = arith.constant 0 : index
    %c0_25 = arith.constant 0 : index
    %30 = vector.load %arg9[%c0_23, %c0_24, %c0_25] : memref<4x8x1xf32, #tpu.memory_space<vmem>>, vector<4x8x1xf32>
    tpu.vector_store %arg9[%c0_23, %c0_24, %c0_25], %29 {strides = array<i32>} : memref<4x8x1xf32, #tpu.memory_space<vmem>>, vector<4x8x1xf32>,
    %c0_26 = arith.constant 0 : index
    %c0_27 = arith.constant 0 : index
    %c0_28 = arith.constant 0 : index
    %31 = vector.load %arg10[%c0_26, %c0_27, %c0_28] : memref<4x8x16xf32, #tpu.memory_space<vmem>>, vector<4x8x16xf32>
    %32 = vector.broadcast %21 : vector<4x8x1xf32> to vector<4x8x16xf32>
    %33 = arith.mulf %32, %31 : vector<4x8x16xf32>
    %34 = arith.truncf %24 : vector<4x8x8xf32> to vector<4x8x8xbf16>
    %cst_29 = arith.constant dense<0.000000e+00> : vector<4x8x16xf32>
    %35 = tpu.matmul %34, %10, %cst_29 {dimension_numbers = #tpu.dot_dimension_numbers<[2], [1], [1], [2], [0, 0, 0, 1, 1, 2], [0], [0]>} : vector<4x8x8xbf16>, vector<4x8x16xbf16>, vector<4x8x16xf32> -> vector<4x8x16xf32>
    %36 = arith.addf %33, %35 : vector<4x8x16xf32>
    %c0_30 = arith.constant 0 : index
    %c0_31 = arith.constant 0 : index
    %c0_32 = arith.constant 0 : index
    %37 = vector.load %arg10[%c0_30, %c0_31, %c0_32] : memref<4x8x16xf32, #tpu.memory_space<vmem>>, vector<4x8x16xf32>
    tpu.vector_store %arg10[%c0_30, %c0_31, %c0_32], %36 {strides = array<i32>} : memref<4x8x16xf32, #tpu.memory_space<vmem>>, vector<4x8x16xf32>,
    %c0_33 = arith.constant 0 : index
    %c0_34 = arith.constant 0 : index
    %c0_35 = arith.constant 0 : index
    %38 = vector.load %arg8[%c0_33, %c0_34, %c0_35] : memref<4x8x1xf32, #tpu.memory_space<vmem>>, vector<4x8x1xf32>
    tpu.vector_store %arg8[%c0_33, %c0_34, %c0_35], %19 {strides = array<i32>} : memref<4x8x1xf32, #tpu.memory_space<vmem>>, vector<4x8x1xf32>,
    %c0_i32_36 = arith.constant 0 : i32
    %39 = arith.cmpi eq, %arg2, %c0_i32_36 : i32
    %40 = arith.extui %39 : i1 to i32
    %c0_i32_37 = arith.constant 0 : i32
    %41 = arith.cmpi ne, %40, %c0_i32_37 : i32
    scf.if %41 {
      %c0_38 = arith.constant 0 : index
      %c0_39 = arith.constant 0 : index
      %c0_40 = arith.constant 0 : index
      %42 = vector.load %arg10[%c0_38, %c0_39, %c0_40] : memref<4x8x16xf32, #tpu.memory_space<vmem>>, vector<4x8x16xf32>
      %c0_41 = arith.constant 0 : index
      %c0_42 = arith.constant 0 : index
      %c0_43 = arith.constant 0 : index
      %43 = vector.load %arg9[%c0_41, %c0_42, %c0_43] : memref<4x8x1xf32, #tpu.memory_space<vmem>>, vector<4x8x1xf32>
      %44 = tpu.reciprocal %43 {approx = true} : vector<4x8x1xf32> -> vector<4x8x1xf32>
      %45 = vector.broadcast %44 : vector<4x8x1xf32> to vector<4x8x16xf32>
      %46 = arith.mulf %42, %45 : vector<4x8x16xf32>
      %47 = vector.extract_strided_slice %46 {offsets = [0, 0, 0], sizes = [1, 8, 16], strides = [1, 1, 1]} : vector<4x8x16xf32> to vector<1x8x16xf32>
      %48 = vector.shape_cast %47 : vector<1x8x16xf32> to vector<8x16xf32>
      %49 = vector.extract_strided_slice %46 {offsets = [1, 0, 0], sizes = [1, 8, 16], strides = [1, 1, 1]} : vector<4x8x16xf32> to vector<1x8x16xf32>
      %50 = vector.shape_cast %49 : vector<1x8x16xf32> to vector<8x16xf32>
      %51 = vector.extract_strided_slice %46 {offsets = [2, 0, 0], sizes = [1, 8, 16], strides = [1, 1, 1]} : vector<4x8x16xf32> to vector<1x8x16xf32>
      %52 = vector.shape_cast %51 : vector<1x8x16xf32> to vector<8x16xf32>
      %53 = vector.extract_strided_slice %46 {offsets = [3, 0, 0], sizes = [1, 8, 16], strides = [1, 1, 1]} : vector<4x8x16xf32> to vector<1x8x16xf32>
      %54 = vector.shape_cast %53 : vector<1x8x16xf32> to vector<8x16xf32>
      %55 = tpu.concatenate %48, %50, %52, %54 in 1 : vector<8x16xf32>, vector<8x16xf32>, vector<8x16xf32>, vector<8x16xf32> -> vector<8x64xf32>
      %56 = arith.truncf %55 : vector<8x64xf32> to vector<8x64xbf16>
      %c0_44 = arith.constant 0 : index
      %c0_45 = arith.constant 0 : index
      %c0_46 = arith.constant 0 : index
      %57 = vector.load %arg7[%c0_44, %c0_45, %c0_46] : memref<1x8x64xbf16, #tpu.memory_space<vmem>>, vector<1x8x64xbf16>
      %58 = vector.shape_cast %57 : vector<1x8x64xbf16> to vector<8x64xbf16>
      %59 = vector.shape_cast %56 : vector<8x64xbf16> to vector<1x8x64xbf16>
      tpu.vector_store %arg7[%c0_44, %c0_45, %c0_46], %59 {strides = array<i32>} : memref<1x8x64xbf16, #tpu.memory_space<vmem>>, vector<1x8x64xbf16>,
    } else {
    }
    return
  }
  func.func @transform_0(%arg0: i32, %arg1: i32, %arg2: i32) -> (i32, i32, i32, i32) {
    %c0_i32 = arith.constant 0 : i32
    %c0_i32_0 = arith.constant 0 : i32
    %c0_i32_1 = arith.constant 0 : i32
    return %arg0, %c0_i32, %arg1, %c0_i32_0 : i32, i32, i32, i32
  }
  func.func @transform_1(%arg0: i32, %arg1: i32, %arg2: i32) -> (i32, i32, i32, i32) {
    %c0_i32 = arith.constant 0 : i32
    %c0_i32_0 = arith.constant 0 : i32
    %c0_i32_1 = arith.constant 0 : i32
    return %arg0, %c0_i32, %arg2, %c0_i32_0 : i32, i32, i32, i32
  }
  func.func @transform_2(%arg0: i32, %arg1: i32, %arg2: i32) -> (i32, i32, i32, i32) {
    %c0_i32 = arith.constant 0 : i32
    %c0_i32_0 = arith.constant 0 : i32
    %c0_i32_1 = arith.constant 0 : i32
    return %arg0, %c0_i32, %arg2, %c0_i32_0 : i32, i32, i32, i32
  }
  func.func @transform_3(%arg0: i32, %arg1: i32, %arg2: i32) -> (i32, i32) {
    %c0_i32 = arith.constant 0 : i32
    return %arg1, %arg2 : i32, i32
  }
  func.func @transform_4(%arg0: i32, %arg1: i32, %arg2: i32) -> (i32, i32, i32) {
    %c0_i32 = arith.constant 0 : i32
    %c0_i32_0 = arith.constant 0 : i32
    return %arg0, %arg1, %c0_i32 : i32, i32, i32
  }
}

module attributes {stable_mosaic.version = 11 : i64} {
  func.func @_add_layernorm_kernel(%arg0: i32, %arg1: memref<16x64xbf16, #tpu.memory_space<vmem>>, %arg2: memref<16x64xbf16, #tpu.memory_space<vmem>>, %arg3: memref<1x64xf32, #tpu.memory_space<vmem>>, %arg4: memref<1x64xf32, #tpu.memory_space<vmem>>, %arg5: memref<16x64xbf16, #tpu.memory_space<vmem>>) attributes {dimension_semantics = [#tpu.dimension_semantics<parallel>], iteration_bounds = array<i64: 1>, scalar_prefetch = 0 : i64, scratch_operands = 0 : i64, tpu.core_type = #tpu.core_type<tc>, window_params = [{transform_indices = @transform_0, window_bounds = array<i64: 16, 64>}, {transform_indices = @transform_1, window_bounds = array<i64: 16, 64>}, {pipeline_mode = #tpu.pipeline_mode<synchronous>, transform_indices = @transform_2, window_bounds = array<i64: 1, 64>}, {pipeline_mode = #tpu.pipeline_mode<synchronous>, transform_indices = @transform_3, window_bounds = array<i64: 1, 64>}, {transform_indices = @transform_4, window_bounds = array<i64: 16, 64>}]} {
    %c0 = arith.constant 0 : index
    %c0_0 = arith.constant 0 : index
    %0 = vector.load %arg1[%c0, %c0_0] : memref<16x64xbf16, #tpu.memory_space<vmem>>, vector<16x64xbf16>
    %1 = arith.extf %0 : vector<16x64xbf16> to vector<16x64xf32>
    %c0_1 = arith.constant 0 : index
    %c0_2 = arith.constant 0 : index
    %2 = vector.load %arg2[%c0_1, %c0_2] : memref<16x64xbf16, #tpu.memory_space<vmem>>, vector<16x64xbf16>
    %3 = arith.extf %2 : vector<16x64xbf16> to vector<16x64xf32>
    %4 = arith.addf %1, %3 : vector<16x64xf32>
    %cst = arith.constant dense<0.000000e+00> : vector<16xf32>
    %5 = vector.multi_reduction <add>, %4, %cst [1] : vector<16x64xf32> to vector<16xf32>
    %6 = vector.shape_cast %5 : vector<16xf32> to vector<16x1xf32>
    %cst_3 = arith.constant 6.400000e+01 : f32
    %7 = vector.broadcast %cst_3 : f32 to vector<16x1xf32>
    %8 = arith.divf %6, %7 : vector<16x1xf32>
    %9 = vector.broadcast %8 : vector<16x1xf32> to vector<16x64xf32>
    %10 = arith.subf %4, %9 : vector<16x64xf32>
    %11 = vector.broadcast %8 : vector<16x1xf32> to vector<16x64xf32>
    %12 = arith.subf %4, %11 : vector<16x64xf32>
    %13 = arith.mulf %10, %12 : vector<16x64xf32>
    %cst_4 = arith.constant dense<0.000000e+00> : vector<16xf32>
    %14 = vector.multi_reduction <add>, %13, %cst_4 [1] : vector<16x64xf32> to vector<16xf32>
    %15 = vector.shape_cast %14 : vector<16xf32> to vector<16x1xf32>
    %cst_5 = arith.constant 6.400000e+01 : f32
    %16 = vector.broadcast %cst_5 : f32 to vector<16x1xf32>
    %17 = arith.divf %15, %16 : vector<16x1xf32>
    %18 = vector.broadcast %8 : vector<16x1xf32> to vector<16x64xf32>
    %19 = arith.subf %4, %18 : vector<16x64xf32>
    %cst_6 = arith.constant 9.99999974E-6 : f32
    %20 = vector.broadcast %cst_6 : f32 to vector<16x1xf32>
    %21 = arith.addf %17, %20 : vector<16x1xf32>
    %22 = math.rsqrt %21 : vector<16x1xf32>
    %23 = vector.broadcast %22 : vector<16x1xf32> to vector<16x64xf32>
    %24 = arith.mulf %19, %23 : vector<16x64xf32>
    %c0_7 = arith.constant 0 : index
    %c0_8 = arith.constant 0 : index
    %25 = vector.load %arg3[%c0_7, %c0_8] : memref<1x64xf32, #tpu.memory_space<vmem>>, vector<1x64xf32>
    %26 = vector.broadcast %25 : vector<1x64xf32> to vector<16x64xf32>
    %27 = arith.mulf %24, %26 : vector<16x64xf32>
    %c0_9 = arith.constant 0 : index
    %c0_10 = arith.constant 0 : index
    %28 = vector.load %arg4[%c0_9, %c0_10] : memref<1x64xf32, #tpu.memory_space<vmem>>, vector<1x64xf32>
    %29 = vector.broadcast %28 : vector<1x64xf32> to vector<16x64xf32>
    %30 = arith.addf %27, %29 : vector<16x64xf32>
    %31 = arith.truncf %30 : vector<16x64xf32> to vector<16x64xbf16>
    %c0_11 = arith.constant 0 : index
    %c0_12 = arith.constant 0 : index
    %32 = vector.load %arg5[%c0_11, %c0_12] : memref<16x64xbf16, #tpu.memory_space<vmem>>, vector<16x64xbf16>
    tpu.vector_store %arg5[%c0_11, %c0_12], %31 {strides = array<i32>} : memref<16x64xbf16, #tpu.memory_space<vmem>>, vector<16x64xbf16>,
    return
  }
  func.func @transform_0(%arg0: i32) -> (i32, i32) {
    %c0_i32 = arith.constant 0 : i32
    %c0_i32_0 = arith.constant 0 : i32
    return %arg0, %c0_i32 : i32, i32
  }
  func.func @transform_1(%arg0: i32) -> (i32, i32) {
    %c0_i32 = arith.constant 0 : i32
    %c0_i32_0 = arith.constant 0 : i32
    return %arg0, %c0_i32 : i32, i32
  }
  func.func @transform_2(%arg0: i32) -> (i32, i32) {
    %c0_i32 = arith.constant 0 : i32
    %c0_i32_0 = arith.constant 0 : i32
    %c0_i32_1 = arith.constant 0 : i32
    return %c0_i32, %c0_i32_0 : i32, i32
  }
  func.func @transform_3(%arg0: i32) -> (i32, i32) {
    %c0_i32 = arith.constant 0 : i32
    %c0_i32_0 = arith.constant 0 : i32
    %c0_i32_1 = arith.constant 0 : i32
    return %c0_i32, %c0_i32_0 : i32, i32
  }
  func.func @transform_4(%arg0: i32) -> (i32, i32) {
    %c0_i32 = arith.constant 0 : i32
    %c0_i32_0 = arith.constant 0 : i32
    return %arg0, %c0_i32 : i32, i32
  }
}

module attributes {stable_mosaic.version = 11 : i64} {
  func.func @_linear_kernel(%arg0: i32, %arg1: i32, %arg2: i32, %arg3: memref<16x64xbf16, #tpu.memory_space<vmem>>, %arg4: memref<64x256xbf16, #tpu.memory_space<vmem>>, %arg5: memref<1x256xf32, #tpu.memory_space<vmem>>, %arg6: memref<16x256xbf16, #tpu.memory_space<vmem>>, %arg7: memref<16x256xf32, #tpu.memory_space<vmem>>) attributes {dimension_semantics = [#tpu.dimension_semantics<parallel>, #tpu.dimension_semantics<parallel>, #tpu.dimension_semantics<arbitrary>], iteration_bounds = array<i64: 1, 1, 1>, scalar_prefetch = 0 : i64, scratch_operands = 1 : i64, tpu.core_type = #tpu.core_type<tc>, window_params = [{transform_indices = @transform_0, window_bounds = array<i64: 16, 64>}, {transform_indices = @transform_1, window_bounds = array<i64: 64, 256>}, {transform_indices = @transform_2, window_bounds = array<i64: 1, 256>}, {transform_indices = @transform_3, window_bounds = array<i64: 16, 256>}]} {
    %c0_i32 = arith.constant 0 : i32
    %0 = arith.cmpi eq, %arg2, %c0_i32 : i32
    %1 = arith.extui %0 : i1 to i32
    %c0_i32_0 = arith.constant 0 : i32
    %2 = arith.cmpi ne, %1, %c0_i32_0 : i32
    scf.if %2 {
      %cst_10 = arith.constant 0.000000e+00 : f32
      %12 = vector.broadcast %cst_10 : f32 to vector<16x256xf32>
      %c0_11 = arith.constant 0 : index
      %c0_12 = arith.constant 0 : index
      %13 = vector.load %arg7[%c0_11, %c0_12] : memref<16x256xf32, #tpu.memory_space<vmem>>, vector<16x256xf32>
      tpu.vector_store %arg7[%c0_11, %c0_12], %12 {strides = array<i32>} : memref<16x256xf32, #tpu.memory_space<vmem>>, vector<16x256xf32>,
    } else {
    }
    %c0 = arith.constant 0 : index
    %c0_1 = arith.constant 0 : index
    %3 = vector.load %arg7[%c0, %c0_1] : memref<16x256xf32, #tpu.memory_space<vmem>>, vector<16x256xf32>
    %c0_2 = arith.constant 0 : index
    %c0_3 = arith.constant 0 : index
    %4 = vector.load %arg3[%c0_2, %c0_3] : memref<16x64xbf16, #tpu.memory_space<vmem>>, vector<16x64xbf16>
    %c0_4 = arith.constant 0 : index
    %c0_5 = arith.constant 0 : index
    %5 = vector.load %arg4[%c0_4, %c0_5] : memref<64x256xbf16, #tpu.memory_space<vmem>>, vector<64x256xbf16>
    %cst = arith.constant dense<0.000000e+00> : vector<16x256xf32>
    %6 = tpu.matmul %4, %5, %cst {dimension_numbers = #tpu.dot_dimension_numbers<[1], [0], [0], [1], [0, 0, 1, 1], [], []>} : vector<16x64xbf16>, vector<64x256xbf16>, vector<16x256xf32> -> vector<16x256xf32>
    %7 = arith.addf %3, %6 : vector<16x256xf32>
    %c0_6 = arith.constant 0 : index
    %c0_7 = arith.constant 0 : index
    %8 = vector.load %arg7[%c0_6, %c0_7] : memref<16x256xf32, #tpu.memory_space<vmem>>, vector<16x256xf32>
    tpu.vector_store %arg7[%c0_6, %c0_7], %7 {strides = array<i32>} : memref<16x256xf32, #tpu.memory_space<vmem>>, vector<16x256xf32>,
    %c0_i32_8 = arith.constant 0 : i32
    %9 = arith.cmpi eq, %arg2, %c0_i32_8 : i32
    %10 = arith.extui %9 : i1 to i32
    %c0_i32_9 = arith.constant 0 : i32
    %11 = arith.cmpi ne, %10, %c0_i32_9 : i32
    scf.if %11 {
      %c0_10 = arith.constant 0 : index
      %c0_11 = arith.constant 0 : index
      %12 = vector.load %arg7[%c0_10, %c0_11] : memref<16x256xf32, #tpu.memory_space<vmem>>, vector<16x256xf32>
      %c0_12 = arith.constant 0 : index
      %c0_13 = arith.constant 0 : index
      %13 = vector.load %arg5[%c0_12, %c0_13] : memref<1x256xf32, #tpu.memory_space<vmem>>, vector<1x256xf32>
      %14 = vector.broadcast %13 : vector<1x256xf32> to vector<16x256xf32>
      %15 = arith.addf %12, %14 : vector<16x256xf32>
      %cst_14 = arith.constant 0.000000e+00 : f32
      %16 = vector.broadcast %cst_14 : f32 to vector<16x256xf32>
      %17 = arith.maximumf %15, %16 : vector<16x256xf32>
      %18 = arith.truncf %17 : vector<16x256xf32> to vector<16x256xbf16>
      %c0_15 = arith.constant 0 : index
      %c0_16 = arith.constant 0 : index
      %19 = vector.load %arg6[%c0_15, %c0_16] : memref<16x256xbf16, #tpu.memory_space<vmem>>, vector<16x256xbf16>
      tpu.vector_store %arg6[%c0_15, %c0_16], %18 {strides = array<i32>} : memref<16x256xbf16, #tpu.memory_space<vmem>>, vector<16x256xbf16>,
    } else {
    }
    return
  }
  func.func @transform_0(%arg0: i32, %arg1: i32, %arg2: i32) -> (i32, i32) {
    %c0_i32 = arith.constant 0 : i32
    return %arg0, %arg2 : i32, i32
  }
  func.func @transform_1(%arg0: i32, %arg1: i32, %arg2: i32) -> (i32, i32) {
    %c0_i32 = arith.constant 0 : i32
    return %arg2, %arg1 : i32, i32
  }
  func.func @transform_2(%arg0: i32, %arg1: i32, %arg2: i32) -> (i32, i32) {
    %c0_i32 = arith.constant 0 : i32
    %c0_i32_0 = arith.constant 0 : i32
    return %c0_i32, %arg1 : i32, i32
  }
  func.func @transform_3(%arg0: i32, %arg1: i32, %arg2: i32) -> (i32, i32) {
    %c0_i32 = arith.constant 0 : i32
    return %arg0, %arg1 : i32, i32
  }
}

module attributes {stable_mosaic.version = 11 : i64} {
  func.func @_flash_attn_kernel(%arg0: i32, %arg1: i32, %arg2: i32, %arg3: memref<1x4x8x16xbf16, #tpu.memory_space<vmem>>, %arg4: memref<1x4x8x16xbf16, #tpu.memory_space<vmem>>, %arg5: memref<1x4x8x16xbf16, #tpu.memory_space<vmem>>, %arg6: memref<1x8x64xbf16, #tpu.memory_space<vmem>>, %arg7: memref<4x8x1xf32, #tpu.memory_space<vmem>>, %arg8: memref<4x8x1xf32, #tpu.memory_space<vmem>>, %arg9: memref<4x8x16xf32, #tpu.memory_space<vmem>>) attributes {dimension_semantics = [#tpu.dimension_semantics<parallel>, #tpu.dimension_semantics<parallel>, #tpu.dimension_semantics<arbitrary>], iteration_bounds = array<i64: 2, 1, 1>, scalar_prefetch = 0 : i64, scratch_operands = 3 : i64, tpu.core_type = #tpu.core_type<tc>, window_params = [{transform_indices = @transform_0, window_bounds = array<i64: 1, 4, 8, 16>}, {transform_indices = @transform_1, window_bounds = array<i64: 1, 4, 8, 16>}, {transform_indices = @transform_2, window_bounds = array<i64: 1, 4, 8, 16>}, {transform_indices = @transform_3, window_bounds = array<i64: 1, 8, 64>}]} {
    %c0_i32 = arith.constant 0 : i32
    %0 = arith.cmpi eq, %arg2, %c0_i32 : i32
    %1 = arith.extui %0 : i1 to i32
    %c0_i32_0 = arith.constant 0 : i32
    %2 = arith.cmpi ne, %1, %c0_i32_0 : i32
    scf.if %2 {
      %cst_36 = arith.constant 0xFF800000 : f32
      %38 = vector.broadcast %cst_36 : f32 to vector<4x8x1xf32>
      %c0_37 = arith.constant 0 : index
      %c0_38 = arith.constant 0 : index
      %c0_39 = arith.constant 0 : index
      %39 = vector.load %arg7[%c0_37, %c0_38, %c0_39] : memref<4x8x1xf32, #tpu.memory_space<vmem>>, vector<4x8x1xf32>
      tpu.vector_store %arg7[%c0_37, %c0_38, %c0_39], %38 {strides = array<i32>} : memref<4x8x1xf32, #tpu.memory_space<vmem>>, vector<4x8x1xf32>,
      %cst_40 = arith.constant 0.000000e+00 : f32
      %40 = vector.broadcast %cst_40 : f32 to vector<4x8x1xf32>
      %c0_41 = arith.constant 0 : index
      %c0_42 = arith.constant 0 : index
      %c0_43 = arith.constant 0 : index
      %41 = vector.load %arg8[%c0_41, %c0_42, %c0_43] : memref<4x8x1xf32, #tpu.memory_space<vmem>>, vector<4x8x1xf32>
      tpu.vector_store %arg8[%c0_41, %c0_42, %c0_43], %40 {strides = array<i32>} : memref<4x8x1xf32, #tpu.memory_space<vmem>>, vector<4x8x1xf32>,
      %cst_44 = arith.constant 0.000000e+00 : f32
      %42 = vector.broadcast %cst_44 : f32 to vector<4x8x16xf32>
      %c0_45 = arith.constant 0 : index
      %c0_46 = arith.constant 0 : index
      %c0_47 = arith.constant 0 : index
      %43 = vector.load %arg9[%c0_45, %c0_46, %c0_47] : memref<4x8x16xf32, #tpu.memory_space<vmem>>, vector<4x8x16xf32>
      tpu.vector_store %arg9[%c0_45, %c0_46, %c0_47], %42 {strides = array<i32>} : memref<4x8x16xf32, #tpu.memory_space<vmem>>, vector<4x8x16xf32>,
    } else {
    }
    %c0 = arith.constant 0 : index
    %c0_1 = arith.constant 0 : index
    %c0_2 = arith.constant 0 : index
    %c0_3 = arith.constant 0 : index
    %3 = vector.load %arg3[%c0, %c0_1, %c0_2, %c0_3] : memref<1x4x8x16xbf16, #tpu.memory_space<vmem>>, vector<1x4x8x16xbf16>
    %4 = vector.shape_cast %3 : vector<1x4x8x16xbf16> to vector<4x8x16xbf16>
    %cst = arith.constant 2.500000e-01 : bf16
    %5 = vector.broadcast %cst : bf16 to vector<4x8x16xbf16>
    %6 = arith.mulf %4, %5 : vector<4x8x16xbf16>
    %c0_4 = arith.constant 0 : index
    %c0_5 = arith.constant 0 : index
    %c0_6 = arith.constant 0 : index
    %c0_7 = arith.constant 0 : index
    %7 = vector.load %arg4[%c0_4, %c0_5, %c0_6, %c0_7] : memref<1x4x8x16xbf16, #tpu.memory_space<vmem>>, vector<1x4x8x16xbf16>
    %8 = vector.shape_cast %7 : vector<1x4x8x16xbf16> to vector<4x8x16xbf16>
    %c0_8 = arith.constant 0 : index
    %c0_9 = arith.constant 0 : index
    %c0_10 = arith.constant 0 : index
    %c0_11 = arith.constant 0 : index
    %9 = vector.load %arg5[%c0_8, %c0_9, %c0_10, %c0_11] : memref<1x4x8x16xbf16, #tpu.memory_space<vmem>>, vector<1x4x8x16xbf16>
    %10 = vector.shape_cast %9 : vector<1x4x8x16xbf16> to vector<4x8x16xbf16>
    %cst_12 = arith.constant dense<0.000000e+00> : vector<4x8x8xf32>
    %11 = tpu.matmul %6, %8, %cst_12 {dimension_numbers = #tpu.dot_dimension_numbers<[2], [2], [1], [1], [0, 0, 0, 1, 1, 1], [0], [0]>} : vector<4x8x16xbf16>, vector<4x8x16xbf16>, vector<4x8x8xf32> -> vector<4x8x8xf32>
    %c0_13 = arith.constant 0 : index
    %c0_14 = arith.constant 0 : index
    %c0_15 = arith.constant 0 : index
    %12 = vector.load %arg7[%c0_13, %c0_14, %c0_15] : memref<4x8x1xf32, #tpu.memory_space<vmem>>, vector<4x8x1xf32>
    %cst_16 = arith.constant dense<0xFF800000> : vector<4x8xf32>
    %13 = vector.multi_reduction <maximumf>, %11, %cst_16 [2] : vector<4x8x8xf32> to vector<4x8xf32>
    %14 = vector.shape_cast %13 : vector<4x8xf32> to vector<4x8x1xf32>
    %15 = arith.maximumf %12, %14 : vector<4x8x1xf32>
    %16 = arith.subf %12, %15 : vector<4x8x1xf32>
    %17 = math.exp %16 : vector<4x8x1xf32>
    %18 = vector.broadcast %15 : vector<4x8x1xf32> to vector<4x8x8xf32>
    %19 = arith.subf %11, %18 : vector<4x8x8xf32>
    %20 = math.exp %19 : vector<4x8x8xf32>
    %c0_17 = arith.constant 0 : index
    %c0_18 = arith.constant 0 : index
    %c0_19 = arith.constant 0 : index
    %21 = vector.load %arg8[%c0_17, %c0_18, %c0_19] : memref<4x8x1xf32, #tpu.memory_space<vmem>>, vector<4x8x1xf32>
    %22 = arith.mulf %17, %21 : vector<4x8x1xf32>
    %cst_20 = arith.constant dense<0.000000e+00> : vector<4x8xf32>
    %23 = vector.multi_reduction <add>, %20, %cst_20 [2] : vector<4x8x8xf32> to vector<4x8xf32>
    %24 = vector.shape_cast %23 : vector<4x8xf32> to vector<4x8x1xf32>
    %25 = arith.addf %22, %24 : vector<4x8x1xf32>
    %c0_21 = arith.constant 0 : index
    %c0_22 = arith.constant 0 : index
    %c0_23 = arith.constant 0 : index
    %26 = vector.load %arg8[%c0_21, %c0_22, %c0_23] : memref<4x8x1xf32, #tpu.memory_space<vmem>>, vector<4x8x1xf32>
    tpu.vector_store %arg8[%c0_21, %c0_22, %c0_23], %25 {strides = array<i32>} : memref<4x8x1xf32, #tpu.memory_space<vmem>>, vector<4x8x1xf32>,
    %c0_24 = arith.constant 0 : index
    %c0_25 = arith.constant 0 : index
    %c0_26 = arith.constant 0 : index
    %27 = vector.load %arg9[%c0_24, %c0_25, %c0_26] : memref<4x8x16xf32, #tpu.memory_space<vmem>>, vector<4x8x16xf32>
    %28 = vector.broadcast %17 : vector<4x8x1xf32> to vector<4x8x16xf32>
    %29 = arith.mulf %28, %27 : vector<4x8x16xf32>
    %30 = arith.truncf %20 : vector<4x8x8xf32> to vector<4x8x8xbf16>
    %cst_27 = arith.constant dense<0.000000e+00> : vector<4x8x16xf32>
    %31 = tpu.matmul %30, %10, %cst_27 {dimension_numbers = #tpu.dot_dimension_numbers<[2], [1], [1], [2], [0, 0, 0, 1, 1, 2], [0], [0]>} : vector<4x8x8xbf16>, vector<4x8x16xbf16>, vector<4x8x16xf32> -> vector<4x8x16xf32>
    %32 = arith.addf %29, %31 : vector<4x8x16xf32>
    %c0_28 = arith.constant 0 : index
    %c0_29 = arith.constant 0 : index
    %c0_30 = arith.constant 0 : index
    %33 = vector.load %arg9[%c0_28, %c0_29, %c0_30] : memref<4x8x16xf32, #tpu.memory_space<vmem>>, vector<4x8x16xf32>
    tpu.vector_store %arg9[%c0_28, %c0_29, %c0_30], %32 {strides = array<i32>} : memref<4x8x16xf32, #tpu.memory_space<vmem>>, vector<4x8x16xf32>,
    %c0_31 = arith.constant 0 : index
    %c0_32 = arith.constant 0 : index
    %c0_33 = arith.constant 0 : index
    %34 = vector.load %arg7[%c0_31, %c0_32, %c0_33] : memref<4x8x1xf32, #tpu.memory_space<vmem>>, vector<4x8x1xf32>
    tpu.vector_store %arg7[%c0_31, %c0_32, %c0_33], %15 {strides = array<i32>} : memref<4x8x1xf32, #tpu.memory_space<vmem>>, vector<4x8x1xf32>,
    %c0_i32_34 = arith.constant 0 : i32
    %35 = arith.cmpi eq, %arg2, %c0_i32_34 : i32
    %36 = arith.extui %35 : i1 to i32
    %c0_i32_35 = arith.constant 0 : i32
    %37 = arith.cmpi ne, %36, %c0_i32_35 : i32
    scf.if %37 {
      %c0_36 = arith.constant 0 : index
      %c0_37 = arith.constant 0 : index
      %c0_38 = arith.constant 0 : index
      %38 = vector.load %arg9[%c0_36, %c0_37, %c0_38] : memref<4x8x16xf32, #tpu.memory_space<vmem>>, vector<4x8x16xf32>
      %c0_39 = arith.constant 0 : index
      %c0_40 = arith.constant 0 : index
      %c0_41 = arith.constant 0 : index
      %39 = vector.load %arg8[%c0_39, %c0_40, %c0_41] : memref<4x8x1xf32, #tpu.memory_space<vmem>>, vector<4x8x1xf32>
      %40 = tpu.reciprocal %39 {approx = true} : vector<4x8x1xf32> -> vector<4x8x1xf32>
      %41 = vector.broadcast %40 : vector<4x8x1xf32> to vector<4x8x16xf32>
      %42 = arith.mulf %38, %41 : vector<4x8x16xf32>
      %43 = vector.extract_strided_slice %42 {offsets = [0, 0, 0], sizes = [1, 8, 16], strides = [1, 1, 1]} : vector<4x8x16xf32> to vector<1x8x16xf32>
      %44 = vector.shape_cast %43 : vector<1x8x16xf32> to vector<8x16xf32>
      %45 = vector.extract_strided_slice %42 {offsets = [1, 0, 0], sizes = [1, 8, 16], strides = [1, 1, 1]} : vector<4x8x16xf32> to vector<1x8x16xf32>
      %46 = vector.shape_cast %45 : vector<1x8x16xf32> to vector<8x16xf32>
      %47 = vector.extract_strided_slice %42 {offsets = [2, 0, 0], sizes = [1, 8, 16], strides = [1, 1, 1]} : vector<4x8x16xf32> to vector<1x8x16xf32>
      %48 = vector.shape_cast %47 : vector<1x8x16xf32> to vector<8x16xf32>
      %49 = vector.extract_strided_slice %42 {offsets = [3, 0, 0], sizes = [1, 8, 16], strides = [1, 1, 1]} : vector<4x8x16xf32> to vector<1x8x16xf32>
      %50 = vector.shape_cast %49 : vector<1x8x16xf32> to vector<8x16xf32>
      %51 = tpu.concatenate %44, %46, %48, %50 in 1 : vector<8x16xf32>, vector<8x16xf32>, vector<8x16xf32>, vector<8x16xf32> -> vector<8x64xf32>
      %52 = arith.truncf %51 : vector<8x64xf32> to vector<8x64xbf16>
      %c0_42 = arith.constant 0 : index
      %c0_43 = arith.constant 0 : index
      %c0_44 = arith.constant 0 : index
      %53 = vector.load %arg6[%c0_42, %c0_43, %c0_44] : memref<1x8x64xbf16, #tpu.memory_space<vmem>>, vector<1x8x64xbf16>
      %54 = vector.shape_cast %53 : vector<1x8x64xbf16> to vector<8x64xbf16>
      %55 = vector.shape_cast %52 : vector<8x64xbf16> to vector<1x8x64xbf16>
      tpu.vector_store %arg6[%c0_42, %c0_43, %c0_44], %55 {strides = array<i32>} : memref<1x8x64xbf16, #tpu.memory_space<vmem>>, vector<1x8x64xbf16>,
    } else {
    }
    return
  }
  func.func @transform_0(%arg0: i32, %arg1: i32, %arg2: i32) -> (i32, i32, i32, i32) {
    %c0_i32 = arith.constant 0 : i32
    %c0_i32_0 = arith.constant 0 : i32
    %c0_i32_1 = arith.constant 0 : i32
    return %arg0, %c0_i32, %arg1, %c0_i32_0 : i32, i32, i32, i32
  }
  func.func @transform_1(%arg0: i32, %arg1: i32, %arg2: i32) -> (i32, i32, i32, i32) {
    %c0_i32 = arith.constant 0 : i32
    %c0_i32_0 = arith.constant 0 : i32
    %c0_i32_1 = arith.constant 0 : i32
    return %arg0, %c0_i32, %arg2, %c0_i32_0 : i32, i32, i32, i32
  }
  func.func @transform_2(%arg0: i32, %arg1: i32, %arg2: i32) -> (i32, i32, i32, i32) {
    %c0_i32 = arith.constant 0 : i32
    %c0_i32_0 = arith.constant 0 : i32
    %c0_i32_1 = arith.constant 0 : i32
    return %arg0, %c0_i32, %arg2, %c0_i32_0 : i32, i32, i32, i32
  }
  func.func @transform_3(%arg0: i32, %arg1: i32, %arg2: i32) -> (i32, i32, i32) {
    %c0_i32 = arith.constant 0 : i32
    %c0_i32_0 = arith.constant 0 : i32
    return %arg0, %arg1, %c0_i32 : i32, i32, i32
  }
}

module attributes {stable_mosaic.version = 11 : i64} {
  func.func @_linear_kernel(%arg0: i32, %arg1: i32, %arg2: i32, %arg3: memref<16x256xbf16, #tpu.memory_space<vmem>>, %arg4: memref<256x64xbf16, #tpu.memory_space<vmem>>, %arg5: memref<1x64xf32, #tpu.memory_space<vmem>>, %arg6: memref<16x64xbf16, #tpu.memory_space<vmem>>, %arg7: memref<16x64xf32, #tpu.memory_space<vmem>>) attributes {dimension_semantics = [#tpu.dimension_semantics<parallel>, #tpu.dimension_semantics<parallel>, #tpu.dimension_semantics<arbitrary>], iteration_bounds = array<i64: 1, 1, 1>, scalar_prefetch = 0 : i64, scratch_operands = 1 : i64, tpu.core_type = #tpu.core_type<tc>, window_params = [{transform_indices = @transform_0, window_bounds = array<i64: 16, 256>}, {transform_indices = @transform_1, window_bounds = array<i64: 256, 64>}, {transform_indices = @transform_2, window_bounds = array<i64: 1, 64>}, {transform_indices = @transform_3, window_bounds = array<i64: 16, 64>}]} {
    %c0_i32 = arith.constant 0 : i32
    %0 = arith.cmpi eq, %arg2, %c0_i32 : i32
    %1 = arith.extui %0 : i1 to i32
    %c0_i32_0 = arith.constant 0 : i32
    %2 = arith.cmpi ne, %1, %c0_i32_0 : i32
    scf.if %2 {
      %cst_10 = arith.constant 0.000000e+00 : f32
      %12 = vector.broadcast %cst_10 : f32 to vector<16x64xf32>
      %c0_11 = arith.constant 0 : index
      %c0_12 = arith.constant 0 : index
      %13 = vector.load %arg7[%c0_11, %c0_12] : memref<16x64xf32, #tpu.memory_space<vmem>>, vector<16x64xf32>
      tpu.vector_store %arg7[%c0_11, %c0_12], %12 {strides = array<i32>} : memref<16x64xf32, #tpu.memory_space<vmem>>, vector<16x64xf32>,
    } else {
    }
    %c0 = arith.constant 0 : index
    %c0_1 = arith.constant 0 : index
    %3 = vector.load %arg7[%c0, %c0_1] : memref<16x64xf32, #tpu.memory_space<vmem>>, vector<16x64xf32>
    %c0_2 = arith.constant 0 : index
    %c0_3 = arith.constant 0 : index
    %4 = vector.load %arg3[%c0_2, %c0_3] : memref<16x256xbf16, #tpu.memory_space<vmem>>, vector<16x256xbf16>
    %c0_4 = arith.constant 0 : index
    %c0_5 = arith.constant 0 : index
    %5 = vector.load %arg4[%c0_4, %c0_5] : memref<256x64xbf16, #tpu.memory_space<vmem>>, vector<256x64xbf16>
    %cst = arith.constant dense<0.000000e+00> : vector<16x64xf32>
    %6 = tpu.matmul %4, %5, %cst {dimension_numbers = #tpu.dot_dimension_numbers<[1], [0], [0], [1], [0, 0, 1, 1], [], []>} : vector<16x256xbf16>, vector<256x64xbf16>, vector<16x64xf32> -> vector<16x64xf32>
    %7 = arith.addf %3, %6 : vector<16x64xf32>
    %c0_6 = arith.constant 0 : index
    %c0_7 = arith.constant 0 : index
    %8 = vector.load %arg7[%c0_6, %c0_7] : memref<16x64xf32, #tpu.memory_space<vmem>>, vector<16x64xf32>
    tpu.vector_store %arg7[%c0_6, %c0_7], %7 {strides = array<i32>} : memref<16x64xf32, #tpu.memory_space<vmem>>, vector<16x64xf32>,
    %c0_i32_8 = arith.constant 0 : i32
    %9 = arith.cmpi eq, %arg2, %c0_i32_8 : i32
    %10 = arith.extui %9 : i1 to i32
    %c0_i32_9 = arith.constant 0 : i32
    %11 = arith.cmpi ne, %10, %c0_i32_9 : i32
    scf.if %11 {
      %c0_10 = arith.constant 0 : index
      %c0_11 = arith.constant 0 : index
      %12 = vector.load %arg7[%c0_10, %c0_11] : memref<16x64xf32, #tpu.memory_space<vmem>>, vector<16x64xf32>
      %c0_12 = arith.constant 0 : index
      %c0_13 = arith.constant 0 : index
      %13 = vector.load %arg5[%c0_12, %c0_13] : memref<1x64xf32, #tpu.memory_space<vmem>>, vector<1x64xf32>
      %14 = vector.broadcast %13 : vector<1x64xf32> to vector<16x64xf32>
      %15 = arith.addf %12, %14 : vector<16x64xf32>
      %16 = arith.truncf %15 : vector<16x64xf32> to vector<16x64xbf16>
      %c0_14 = arith.constant 0 : index
      %c0_15 = arith.constant 0 : index
      %17 = vector.load %arg6[%c0_14, %c0_15] : memref<16x64xbf16, #tpu.memory_space<vmem>>, vector<16x64xbf16>
      tpu.vector_store %arg6[%c0_14, %c0_15], %16 {strides = array<i32>} : memref<16x64xbf16, #tpu.memory_space<vmem>>, vector<16x64xbf16>,
    } else {
    }
    return
  }
  func.func @transform_0(%arg0: i32, %arg1: i32, %arg2: i32) -> (i32, i32) {
    %c0_i32 = arith.constant 0 : i32
    return %arg0, %arg2 : i32, i32
  }
  func.func @transform_1(%arg0: i32, %arg1: i32, %arg2: i32) -> (i32, i32) {
    %c0_i32 = arith.constant 0 : i32
    return %arg2, %arg1 : i32, i32
  }
  func.func @transform_2(%arg0: i32, %arg1: i32, %arg2: i32) -> (i32, i32) {
    %c0_i32 = arith.constant 0 : i32
    %c0_i32_0 = arith.constant 0 : i32
    return %c0_i32, %arg1 : i32, i32
  }
  func.func @transform_3(%arg0: i32, %arg1: i32, %arg2: i32) -> (i32, i32) {
    %c0_i32 = arith.constant 0 : i32
    return %arg0, %arg1 : i32, i32
  }
}

module attributes {stable_mosaic.version = 11 : i64} {
  func.func @_linear_kernel(%arg0: i32, %arg1: i32, %arg2: i32, %arg3: memref<16x64xbf16, #tpu.memory_space<vmem>>, %arg4: memref<64x128xbf16, #tpu.memory_space<vmem>>, %arg5: memref<1x128xf32, #tpu.memory_space<vmem>>, %arg6: memref<16x128xbf16, #tpu.memory_space<vmem>>, %arg7: memref<16x128xf32, #tpu.memory_space<vmem>>) attributes {dimension_semantics = [#tpu.dimension_semantics<parallel>, #tpu.dimension_semantics<parallel>, #tpu.dimension_semantics<arbitrary>], iteration_bounds = array<i64: 1, 1, 1>, scalar_prefetch = 0 : i64, scratch_operands = 1 : i64, tpu.core_type = #tpu.core_type<tc>, window_params = [{transform_indices = @transform_0, window_bounds = array<i64: 16, 64>}, {transform_indices = @transform_1, window_bounds = array<i64: 64, 128>}, {transform_indices = @transform_2, window_bounds = array<i64: 1, 128>}, {transform_indices = @transform_3, window_bounds = array<i64: 16, 128>}]} {
    %c0_i32 = arith.constant 0 : i32
    %0 = arith.cmpi eq, %arg2, %c0_i32 : i32
    %1 = arith.extui %0 : i1 to i32
    %c0_i32_0 = arith.constant 0 : i32
    %2 = arith.cmpi ne, %1, %c0_i32_0 : i32
    scf.if %2 {
      %cst_10 = arith.constant 0.000000e+00 : f32
      %12 = vector.broadcast %cst_10 : f32 to vector<16x128xf32>
      %c0_11 = arith.constant 0 : index
      %c0_12 = arith.constant 0 : index
      %13 = vector.load %arg7[%c0_11, %c0_12] : memref<16x128xf32, #tpu.memory_space<vmem>>, vector<16x128xf32>
      tpu.vector_store %arg7[%c0_11, %c0_12], %12 {strides = array<i32>} : memref<16x128xf32, #tpu.memory_space<vmem>>, vector<16x128xf32>,
    } else {
    }
    %c0 = arith.constant 0 : index
    %c0_1 = arith.constant 0 : index
    %3 = vector.load %arg7[%c0, %c0_1] : memref<16x128xf32, #tpu.memory_space<vmem>>, vector<16x128xf32>
    %c0_2 = arith.constant 0 : index
    %c0_3 = arith.constant 0 : index
    %4 = vector.load %arg3[%c0_2, %c0_3] : memref<16x64xbf16, #tpu.memory_space<vmem>>, vector<16x64xbf16>
    %c0_4 = arith.constant 0 : index
    %c0_5 = arith.constant 0 : index
    %5 = vector.load %arg4[%c0_4, %c0_5] : memref<64x128xbf16, #tpu.memory_space<vmem>>, vector<64x128xbf16>
    %cst = arith.constant dense<0.000000e+00> : vector<16x128xf32>
    %6 = tpu.matmul %4, %5, %cst {dimension_numbers = #tpu.dot_dimension_numbers<[1], [0], [0], [1], [0, 0, 1, 1], [], []>} : vector<16x64xbf16>, vector<64x128xbf16>, vector<16x128xf32> -> vector<16x128xf32>
    %7 = arith.addf %3, %6 : vector<16x128xf32>
    %c0_6 = arith.constant 0 : index
    %c0_7 = arith.constant 0 : index
    %8 = vector.load %arg7[%c0_6, %c0_7] : memref<16x128xf32, #tpu.memory_space<vmem>>, vector<16x128xf32>
    tpu.vector_store %arg7[%c0_6, %c0_7], %7 {strides = array<i32>} : memref<16x128xf32, #tpu.memory_space<vmem>>, vector<16x128xf32>,
    %c0_i32_8 = arith.constant 0 : i32
    %9 = arith.cmpi eq, %arg2, %c0_i32_8 : i32
    %10 = arith.extui %9 : i1 to i32
    %c0_i32_9 = arith.constant 0 : i32
    %11 = arith.cmpi ne, %10, %c0_i32_9 : i32
    scf.if %11 {
      %c0_10 = arith.constant 0 : index
      %c0_11 = arith.constant 0 : index
      %12 = vector.load %arg7[%c0_10, %c0_11] : memref<16x128xf32, #tpu.memory_space<vmem>>, vector<16x128xf32>
      %c0_12 = arith.constant 0 : index
      %c0_13 = arith.constant 0 : index
      %13 = vector.load %arg5[%c0_12, %c0_13] : memref<1x128xf32, #tpu.memory_space<vmem>>, vector<1x128xf32>
      %14 = vector.broadcast %13 : vector<1x128xf32> to vector<16x128xf32>
      %15 = arith.addf %12, %14 : vector<16x128xf32>
      %16 = arith.truncf %15 : vector<16x128xf32> to vector<16x128xbf16>
      %c0_14 = arith.constant 0 : index
      %c0_15 = arith.constant 0 : index
      %17 = vector.load %arg6[%c0_14, %c0_15] : memref<16x128xbf16, #tpu.memory_space<vmem>>, vector<16x128xbf16>
      tpu.vector_store %arg6[%c0_14, %c0_15], %16 {strides = array<i32>} : memref<16x128xbf16, #tpu.memory_space<vmem>>, vector<16x128xbf16>,
    } else {
    }
    return
  }
  func.func @transform_0(%arg0: i32, %arg1: i32, %arg2: i32) -> (i32, i32) {
    %c0_i32 = arith.constant 0 : i32
    return %arg0, %arg2 : i32, i32
  }
  func.func @transform_1(%arg0: i32, %arg1: i32, %arg2: i32) -> (i32, i32) {
    %c0_i32 = arith.constant 0 : i32
    return %arg2, %arg1 : i32, i32
  }
  func.func @transform_2(%arg0: i32, %arg1: i32, %arg2: i32) -> (i32, i32) {
    %c0_i32 = arith.constant 0 : i32
    %c0_i32_0 = arith.constant 0 : i32
    return %c0_i32, %arg1 : i32, i32
  }
  func.func @transform_3(%arg0: i32, %arg1: i32, %arg2: i32) -> (i32, i32) {
    %c0_i32 = arith.constant 0 : i32
    return %arg0, %arg1 : i32, i32
  }
}

module attributes {stable_mosaic.version = 11 : i64} {
  func.func @_linear_kernel(%arg0: i32, %arg1: i32, %arg2: i32, %arg3: memref<16x64xbf16, #tpu.memory_space<vmem>>, %arg4: memref<64x128xbf16, #tpu.memory_space<vmem>>, %arg5: memref<1x128xf32, #tpu.memory_space<vmem>>, %arg6: memref<16x128xf32, #tpu.memory_space<vmem>>, %arg7: memref<16x128xf32, #tpu.memory_space<vmem>>) attributes {dimension_semantics = [#tpu.dimension_semantics<parallel>, #tpu.dimension_semantics<parallel>, #tpu.dimension_semantics<arbitrary>], iteration_bounds = array<i64: 1, 1, 1>, scalar_prefetch = 0 : i64, scratch_operands = 1 : i64, tpu.core_type = #tpu.core_type<tc>, window_params = [{transform_indices = @transform_0, window_bounds = array<i64: 16, 64>}, {transform_indices = @transform_1, window_bounds = array<i64: 64, 128>}, {transform_indices = @transform_2, window_bounds = array<i64: 1, 128>}, {transform_indices = @transform_3, window_bounds = array<i64: 16, 128>}]} {
    %c0_i32 = arith.constant 0 : i32
    %0 = arith.cmpi eq, %arg2, %c0_i32 : i32
    %1 = arith.extui %0 : i1 to i32
    %c0_i32_0 = arith.constant 0 : i32
    %2 = arith.cmpi ne, %1, %c0_i32_0 : i32
    scf.if %2 {
      %cst_10 = arith.constant 0.000000e+00 : f32
      %12 = vector.broadcast %cst_10 : f32 to vector<16x128xf32>
      %c0_11 = arith.constant 0 : index
      %c0_12 = arith.constant 0 : index
      %13 = vector.load %arg7[%c0_11, %c0_12] : memref<16x128xf32, #tpu.memory_space<vmem>>, vector<16x128xf32>
      tpu.vector_store %arg7[%c0_11, %c0_12], %12 {strides = array<i32>} : memref<16x128xf32, #tpu.memory_space<vmem>>, vector<16x128xf32>,
    } else {
    }
    %c0 = arith.constant 0 : index
    %c0_1 = arith.constant 0 : index
    %3 = vector.load %arg7[%c0, %c0_1] : memref<16x128xf32, #tpu.memory_space<vmem>>, vector<16x128xf32>
    %c0_2 = arith.constant 0 : index
    %c0_3 = arith.constant 0 : index
    %4 = vector.load %arg3[%c0_2, %c0_3] : memref<16x64xbf16, #tpu.memory_space<vmem>>, vector<16x64xbf16>
    %c0_4 = arith.constant 0 : index
    %c0_5 = arith.constant 0 : index
    %5 = vector.load %arg4[%c0_4, %c0_5] : memref<64x128xbf16, #tpu.memory_space<vmem>>, vector<64x128xbf16>
    %cst = arith.constant dense<0.000000e+00> : vector<16x128xf32>
    %6 = tpu.matmul %4, %5, %cst {dimension_numbers = #tpu.dot_dimension_numbers<[1], [0], [0], [1], [0, 0, 1, 1], [], []>} : vector<16x64xbf16>, vector<64x128xbf16>, vector<16x128xf32> -> vector<16x128xf32>
    %7 = arith.addf %3, %6 : vector<16x128xf32>
    %c0_6 = arith.constant 0 : index
    %c0_7 = arith.constant 0 : index
    %8 = vector.load %arg7[%c0_6, %c0_7] : memref<16x128xf32, #tpu.memory_space<vmem>>, vector<16x128xf32>
    tpu.vector_store %arg7[%c0_6, %c0_7], %7 {strides = array<i32>} : memref<16x128xf32, #tpu.memory_space<vmem>>, vector<16x128xf32>,
    %c0_i32_8 = arith.constant 0 : i32
    %9 = arith.cmpi eq, %arg2, %c0_i32_8 : i32
    %10 = arith.extui %9 : i1 to i32
    %c0_i32_9 = arith.constant 0 : i32
    %11 = arith.cmpi ne, %10, %c0_i32_9 : i32
    scf.if %11 {
      %c0_10 = arith.constant 0 : index
      %c0_11 = arith.constant 0 : index
      %12 = vector.load %arg7[%c0_10, %c0_11] : memref<16x128xf32, #tpu.memory_space<vmem>>, vector<16x128xf32>
      %c0_12 = arith.constant 0 : index
      %c0_13 = arith.constant 0 : index
      %13 = vector.load %arg5[%c0_12, %c0_13] : memref<1x128xf32, #tpu.memory_space<vmem>>, vector<1x128xf32>
      %14 = vector.broadcast %13 : vector<1x128xf32> to vector<16x128xf32>
      %15 = arith.addf %12, %14 : vector<16x128xf32>
      %c0_14 = arith.constant 0 : index
      %c0_15 = arith.constant 0 : index
      %16 = vector.load %arg6[%c0_14, %c0_15] : memref<16x128xf32, #tpu.memory_space<vmem>>, vector<16x128xf32>
      tpu.vector_store %arg6[%c0_14, %c0_15], %15 {strides = array<i32>} : memref<16x128xf32, #tpu.memory_space<vmem>>, vector<16x128xf32>,
    } else {
    }
    return
  }
  func.func @transform_0(%arg0: i32, %arg1: i32, %arg2: i32) -> (i32, i32) {
    %c0_i32 = arith.constant 0 : i32
    return %arg0, %arg2 : i32, i32
  }
  func.func @transform_1(%arg0: i32, %arg1: i32, %arg2: i32) -> (i32, i32) {
    %c0_i32 = arith.constant 0 : i32
    return %arg2, %arg1 : i32, i32
  }
  func.func @transform_2(%arg0: i32, %arg1: i32, %arg2: i32) -> (i32, i32) {
    %c0_i32 = arith.constant 0 : i32
    %c0_i32_0 = arith.constant 0 : i32
    return %c0_i32, %arg1 : i32, i32
  }
  func.func @transform_3(%arg0: i32, %arg1: i32, %arg2: i32) -> (i32, i32) {
    %c0_i32 = arith.constant 0 : i32
    return %arg0, %arg1 : i32, i32
  }
}

</mosaic_0001>

<bundles_post_ra>
// kernel: transformer_forward.55
= control target key start
LH: loop header
LB: loop body
LE: loop exit
PB: predicated region body
PF: predicated region fallthrough
CT: control target
= control target key end

     0   :  { %vm19_vm0 = vcmask 523264   ;;  %v133_v1 = vmov 0.0   ;;  %vm98_vm1 = vcmask 519168   ;;  %s183_s1 = inlined_call_operand.vmem [shape: bf16[64,64], index: 1, kind: input, shape index: {}]   ;;  %s184_s2 = inlined_call_operand.vmem [shape: f32[1,64], index: 2, kind: input, shape index: {}]   ;;  %s185_s0 = inlined_call_operand.vmem [shape: bf16[16,64], index: 0, kind: input, shape index: {}]   ;;  %s186_s3 = inlined_call_operand.vmem [shape: bf16[16,64], index: 3, kind: output, shape index: {}]  }
   0x1   :  { %v130_v0 = vld [vmem:[%s183_s1 + $0x18] sm:$0xff]  ;;  %20 = vst.msk [vmem:[#allocation2] sm:$0xff] %vm19_vm0, %v133_v1  ;;  %v129_v2 = vld [vmem:[%s183_s1 + $0x10] sm:$0xff]  ;;  %v128_v3 = vld [vmem:[%s183_s1 + $0x8] sm:$0xff] }
   0x2   :  { %21 = vst.msk [vmem:[#allocation2 + $0x8] sm:$0xff] %vm19_vm0, %v133_v1  ;;  %71 = vmatpush.bf16.msra.mxu0 %v130_v0  ;;  %v127_v4 = vld [vmem:[%s183_s1] sm:$0xff] }
   0x3   :  { %v126_v5 = vld [vmem:[%s185_s0] sm:$0xff] }
   0x4   :  { %v132_v10 = vld [vmem:[%s184_s2] ss:$0 sm:$0xff] }
   0x6   :  { %72 = vmatpush.bf16.msra.mxu0 %v129_v2 }
   0x8   :  { %v22_v6 = vld [vmem:[#allocation2] sm:$0xff] }
   0x9   :  { %v23_v9 = vld [vmem:[#allocation2 + $0x8] sm:$0xff] }
   0xa   :  { %73 = vmatpush.bf16.msra.mxu0 %v128_v3 }
   0xe   :  { %74 = vmatpush.bf16.msra.mxu0 %v127_v4 }
  0x11   :  { %125 = vmatmul.msk.bf16.vlgmr.msra.gmra.mxu0 %vm19_vm0, %v126_v5 }
  0x8e   :  { %v76_v7 = vpop.f32.mrf.mxu0 }
  0x8f   :  { %v81_v8 = vadd.f32 %v76_v7, %v22_v6 }
  0x91   :  { %83 = vst.msk [vmem:[#allocation2] sm:$0xff] %vm19_vm0, %v81_v8 }
  0x96   :  { %v78_v11 = vpop.f32.mrf.mxu0 }
  0x97   :  { %v82_v12 = vadd.f32 %v78_v11, %v23_v9 }
  0x98   :  { %v88_v13 = vld [vmem:[#allocation2] sm:$0xff] }
  0x99   :  { %v94_v14 = vadd.f32 %v132_v10, %v88_v13  ;;  %84 = vst.msk [vmem:[#allocation2 + $0x8] sm:$0xff] %vm19_vm0, %v82_v12 }
  0x9b   :  { %v96_v15 = vpack.c.bf16 %v94_v14, %v94_v14 }
  0x9d   :  { %99 = vst.msk [vmem:[%s186_s3] sm:$0xf] %vm98_vm1, %v96_v15 }
  0xa0   :  { %v89_v16 = vld [vmem:[#allocation2 + $0x8] sm:$0xff] }
  0xa1   :  { %v95_v17 = vadd.f32 %v132_v10, %v89_v16 }
  0xa3   :  { %v97_v18 = vpack.c.bf16 %v95_v17, %v95_v17 }
  0xa5   :  { %100 = vst.msk [vmem:[%s186_s3 + $0x4] sm:$0xf] %vm98_vm1, %v97_v18 }

// kernel: transformer_forward.53
= control target key start
LH: loop header
LB: loop body
LE: loop exit
PB: predicated region body
PF: predicated region fallthrough
CT: control target
= control target key end

     0   :  { %vm20_vm0 = vcmask 523264   ;;  %v199_v16 = vmov 0.0   ;;  %vm142_vm1 = vcmask 1043456   ;;  %vm143_vm2 = vcmask 523268   ;;  %s286_s1 = inlined_call_operand.vmem [shape: bf16[64,192], index: 1, kind: input, shape index: {}]   ;;  %s287_s0 = inlined_call_operand.vmem [shape: bf16[16,64], index: 0, kind: input, shape index: {}]   ;;  %s288_s2 = inlined_call_operand.vmem [shape: f32[1,192], index: 2, kind: input, shape index: {}]   ;;  %s289_s3 = inlined_call_operand.vmem [shape: bf16[16,192], index: 3, kind: output, shape index: {}]  }
   0x1   :  { %v181_v0 = vld [vmem:[%s286_s1 + $0x30] sm:$0xf]  ;;  %v197_v1 = vld [vmem:[%s286_s1 + $0x34] sm:$0xf0]  ;;  %v196_v2 = vld [vmem:[%s286_s1 + $0x34] sm:$0xf] }
   0x2   :  { %v182_v3 = vor.u32 %v197_v1, %v181_v0  ;;  %v183_v4 = vld [vmem:[%s286_s1 + $0x38] sm:$0xf0]  ;;  %v173_v5 = vld [vmem:[%s286_s1 + $0x20] sm:$0xf]  ;;  %v195_v6 = vld [vmem:[%s286_s1 + $0x24] sm:$0xf0] }
   0x3   :  { %v186_v7 = vor.u32 %v196_v2, %v183_v4  ;;  %v194_v8 = vld [vmem:[%s286_s1 + $0x24] sm:$0xf]  ;;  %v175_v9 = vld [vmem:[%s286_s1 + $0x28] sm:$0xf0]  ;;  %v174_v10 = vor.u32 %v195_v6, %v173_v5  ;;  %v165_v12 = vld [vmem:[%s286_s1 + $0x10] sm:$0xf] }
   0x4   :  { %91 = vmatpush.bf16.msra.mxu0 %v182_v3  ;;  %v178_v11 = vor.u32 %v194_v8, %v175_v9  ;;  %v193_v13 = vld [vmem:[%s286_s1 + $0x14] sm:$0xf0]  ;;  %v192_v14 = vld [vmem:[%s286_s1 + $0x14] sm:$0xf]  ;;  %v167_v15 = vld [vmem:[%s286_s1 + $0x18] sm:$0xf0] }
   0x5   :  { %105 = vmatpush.bf16.msra.mxu1 %v186_v7  ;;  %21 = vst.msk [vmem:[#allocation2 + $0x8] sm:$0xff] %vm20_vm0, %v199_v16  ;;  %v166_v17 = vor.u32 %v193_v13, %v165_v12  ;;  %v170_v18 = vor.u32 %v192_v14, %v167_v15  ;;  %v157_v19 = vld [vmem:[%s286_s1] sm:$0xf]  ;;  %v191_v20 = vld [vmem:[%s286_s1 + $0x4] sm:$0xf0]  ;;  %vm144_vm3 = vmor %vm143_vm2, %vm142_vm1 }
   0x6   :  { %23 = vst.msk [vmem:[#allocation2 + $0x18] sm:$0xff] %vm20_vm0, %v199_v16  ;;  %v190_v21 = vld [vmem:[%s286_s1 + $0x4] sm:$0xf]  ;;  %v159_v22 = vld [vmem:[%s286_s1 + $0x8] sm:$0xf0]  ;;  %v158_v23 = vor.u32 %v191_v20, %v157_v19 }
   0x7   :  { %v162_v24 = vor.u32 %v190_v21, %v159_v22  ;;  %v189_v25 = vld [vmem:[%s287_s0] sm:$0xff] }
   0x8   :  { %92 = vmatpush.bf16.msra.mxu0 %v174_v10  ;;  %v130_v30 = vld [vmem:[%s288_s2] sm:$0x3] }
   0x9   :  { %106 = vmatpush.bf16.msra.mxu1 %v178_v11  ;;  %v132_v31 = vperm.slane %v130_v30, 0  ;;  %v133_v33 = vperm.slane %v130_v30, 1 }
   0xc   :  { %93 = vmatpush.bf16.msra.mxu0 %v166_v17  ;;  %v25_v26 = vld [vmem:[#allocation2 + $0x8] sm:$0xff] }
   0xd   :  { %107 = vmatpush.bf16.msra.mxu1 %v170_v18  ;;  %v27_v32 = vld [vmem:[#allocation2 + $0x18] sm:$0xff] }
  0x10   :  { %94 = vmatpush.bf16.msra.mxu0 %v158_v23 }
  0x11   :  { %108 = vmatpush.bf16.msra.mxu1 %v162_v24 }
  0x13   :  { %187 = vmatmul.msk.bf16.vlgmr.msra.gmra.mxu0 %vm20_vm0, %v189_v25 }
  0x14   :  { %188 = vmatmul.msk.bf16.vlgmr.msra.gmra.mxu1 %vm20_vm0, %v189_v25 }
  0x90   :  { %v96_v27 = vpop.f32.mrf.mxu0 }
  0x91   :  { %v110_v28 = vpop.f32.mrf.mxu1  ;;  %v136_v36 = vadd.f32 %v132_v31, %v96_v27 }
  0x92   :  { %v116_v29 = vadd.f32 %v110_v28, %v25_v26 }
  0x94   :  { %120 = vst.msk [vmem:[#allocation2 + $0x8] sm:$0xff] %vm20_vm0, %v116_v29 }
  0x98   :  { %v98_v34 = vpop.f32.mrf.mxu0 }
  0x99   :  { %v112_v35 = vpop.f32.mrf.mxu1  ;;  %v138_v42 = vadd.f32 %v132_v31, %v98_v34 }
  0x9a   :  { %v118_v37 = vadd.f32 %v112_v35, %v27_v32 }
  0x9b   :  { %v127_v38 = vld [vmem:[#allocation2 + $0x8] sm:$0xff] }
  0x9c   :  { %v137_v39 = vadd.f32 %v133_v33, %v127_v38  ;;  %122 = vst.msk [vmem:[#allocation2 + $0x18] sm:$0xff] %vm20_vm0, %v118_v37 }
  0x9e   :  { %v140_v40 = vpack.c.bf16 %v137_v39, %v136_v36 }
  0xa0   :  { %145 = vst.msk [vmem:[%s289_s3] sm:$0xff] %vm144_vm3, %v140_v40 }
  0xa3   :  { %v129_v41 = vld [vmem:[#allocation2 + $0x18] sm:$0xff] }
  0xa4   :  { %v139_v43 = vadd.f32 %v133_v33, %v129_v41 }
  0xa6   :  { %v141_v44 = vpack.c.bf16 %v139_v43, %v138_v42 }
  0xa8   :  { %146 = vst.msk [vmem:[%s289_s3 + $0x8] sm:$0xff] %vm144_vm3, %v141_v44 }

// kernel: transformer_forward.56
= control target key start
LH: loop header
LB: loop body
LE: loop exit
PB: predicated region body
PF: predicated region fallthrough
CT: control target
= control target key end

     0   :  { %vm27_vm0 = vcmask 523264   ;;  %v117_v10 = vmov 64.0   ;;  %vm93_vm6 = vcmask 519168   ;;  %s165_s0 = inlined_call_operand.vmem [shape: bf16[16,64], index: 0, kind: input, shape index: {}]   ;;  %s166_s1 = inlined_call_operand.vmem [shape: bf16[16,64], index: 1, kind: input, shape index: {}]   ;;  %s167_s2 = inlined_call_operand.vmem [shape: f32[1,64], index: 2, kind: input, shape index: {}]   ;;  %s168_s3 = inlined_call_operand.vmem [shape: f32[1,64], index: 3, kind: input, shape index: {}]   ;;  %s169_s4 = inlined_call_operand.vmem [shape: bf16[16,64], index: 4, kind: output, shape index: {}]  }
   0x1   :  { %v101_v0 = vld [vmem:[%s165_s0] sm:$0xff]   ;;  %111 = vrcp.f32 %v117_v10 }
   0x2   :  { %v105_v1 = vld [vmem:[%s166_s1] sm:$0xff]   ;;  %v102_v2 = vunpack.c.l.bf16 %v101_v0  ;;  %v103_v5 = vunpack.c.h.bf16 %v101_v0 }
   0x3   :  { %v106_v3 = vunpack.c.l.bf16 %v105_v1  ;;  %v107_v6 = vunpack.c.h.bf16 %v105_v1  ;;  %v109_v41 = vld [vmem:[%s167_s2] ss:$0 sm:$0xff] }
   0x4   :  { %v110_v44 = vld [vmem:[%s168_s3] ss:$0 sm:$0xff] }
   0x5   :  { %v25_v4 = vadd.f32 %v106_v3, %v102_v2  ;;  %v26_v8 = vadd.f32 %v107_v6, %v103_v5 }
   0x7   :  { %v28_v7 = vsel %vm27_vm0, %v25_v4, 0.0  ;;  %v31_v9 = vsel %vm27_vm0, %v26_v8, 0.0  ;;  %v112_v11 = vpop.eup %111 }
   0x8   :  { %29 = vadd.xlane.f32.xlu0 %v28_v7  ;;  %v35_v12 = vmul.f32 64.0, %v112_v11  ;;  %vm39_vm1 = vweird.f32 %v112_v11 }
   0xa   :  { %v36_v13 = vsub.f32 1.0, %v35_v12 }
   0xc   :  { %v37_v14 = vmul.f32 %v112_v11, %v36_v13 }
   0xe   :  { %v38_v15 = vadd.f32 %v112_v11, %v37_v14 }
  0x10   :  { %32 = vadd.xlane.f32.xlu0 %v31_v9  ;;  %v40_v16 = vsel %vm39_vm1, %v112_v11, %v38_v15 }
  0x7b   :  { %v30_v17 = vpop.xlane.xlu0 %29 }
  0x7c   :  { %v41_v18 = vmul.f32 %v40_v16, %v30_v17 }
  0x7e   :  { %v43_v19 = vsub.f32 %v25_v4, %v41_v18 }
  0x80   :  { %v45_v20 = vmul.f32 %v43_v19, %v43_v19 }
  0x82   :  { %v47_v21 = vsel %vm27_vm0, %v45_v20, 0.0 }
  0x83   :  { %48 = vadd.xlane.f32.xlu1 %v47_v21  ;;  %v33_v22 = vpop.xlane.xlu0 %32 }
  0x84   :  { %v42_v23 = vmul.f32 %v40_v16, %v33_v22 }
  0x86   :  { %v44_v24 = vsub.f32 %v26_v8, %v42_v23 }
  0x88   :  { %v46_v25 = vmul.f32 %v44_v24, %v44_v24 }
  0x8a   :  { %v50_v26 = vsel %vm27_vm0, %v46_v25, 0.0 }
  0x8b   :  { %51 = vadd.xlane.f32.xlu1 %v50_v26 }
  0xf6   :  { %v49_v27 = vpop.xlane.xlu1 %48 }
  0xf7   :  { %v53_v28 = vmul.f32 %v49_v27, %v40_v16 }
  0xf9   :  { %v55_v29 = vadd.f32 1e-05, %v53_v28 }
  0xfb   :  { %113 = vrsqrt.f32 %v55_v29  ;;  %vm63_vm3 = vweird.f32 %v55_v29 }
  0xfe   :  { %v52_v30 = vpop.xlane.xlu1 %51 }
  0xff   :  { %v54_v31 = vmul.f32 %v52_v30, %v40_v16 }
 0x101   :  { %v114_v32 = vpop.eup %113  ;;  %v56_v33 = vadd.f32 1e-05, %v54_v31 }
 0x102   :  { %v58_v34 = vmul.f32 %v114_v32, %v55_v29  ;;  %vm64_vm2 = vweird.f32 %v114_v32 }
 0x103   :  { %115 = vrsqrt.f32 %v56_v33  ;;  %vm65_vm4 = vmor %vm63_vm3, %vm64_vm2  ;;  %vm73_vm7 = vweird.f32 %v56_v33 }
 0x104   :  { %v59_v35 = vmul.f32 %v114_v32, %v58_v34 }
 0x106   :  { %v60_v36 = vmul.f32 0.5, %v59_v35 }
 0x108   :  { %v61_v37 = vsub.f32 1.5, %v60_v36 }
 0x109   :  { %v116_v38 = vpop.eup %115 }
 0x10a   :  { %v62_v39 = vmul.f32 %v114_v32, %v61_v37  ;;  %v68_v40 = vmul.f32 %v116_v38, %v56_v33  ;;  %vm74_vm5 = vweird.f32 %v116_v38 }
 0x10b   :  { %vm75_vm8 = vmor %vm73_vm7, %vm74_vm5 }
 0x10c   :  { %v66_v42 = vsel %vm65_vm4, %v114_v32, %v62_v39  ;;  %v69_v43 = vmul.f32 %v116_v38, %v68_v40 }
 0x10d   :  { %v77_v45 = vmul.f32 %v66_v42, %v43_v19 }
 0x10e   :  { %v70_v46 = vmul.f32 0.5, %v69_v43 }
 0x10f   :  { %v83_v47 = vmul.f32 %v109_v41, %v77_v45 }
 0x110   :  { %v71_v48 = vsub.f32 1.5, %v70_v46 }
 0x111   :  { %v89_v49 = vadd.f32 %v110_v44, %v83_v47 }
 0x112   :  { %v72_v50 = vmul.f32 %v116_v38, %v71_v48 }
 0x113   :  { %v91_v51 = vpack.c.bf16 %v89_v49, %v89_v49 }
 0x114   :  { %v76_v52 = vsel %vm75_vm8, %v116_v38, %v72_v50 }
 0x115   :  { %94 = vst.msk [vmem:[%s169_s4] sm:$0xf] %vm93_vm6, %v91_v51  ;;  %v78_v53 = vmul.f32 %v76_v52, %v44_v24 }
 0x117   :  { %v84_v54 = vmul.f32 %v109_v41, %v78_v53 }
 0x119   :  { %v90_v55 = vadd.f32 %v110_v44, %v84_v54 }
 0x11b   :  { %v92_v56 = vpack.c.bf16 %v90_v55, %v90_v55 }
 0x11d   :  { %95 = vst.msk [vmem:[%s169_s4 + $0x4] sm:$0xf] %vm93_vm6, %v92_v56 }

// kernel: transformer_forward.54
= control target key start
LH: loop header
LB: loop body
LE: loop exit
PB: predicated region body
PF: predicated region fallthrough
CT: control target
= control target key end

     0   :  { %s1001_s15 = smov 0   ;;  %s1003_s16 = smov 0   ;;  %s1138_s0 = inlined_call_operand.vmem [shape: bf16[2,4,8,16], index: 0, kind: input, shape index: {}]   ;;  %s1139_s1 = inlined_call_operand.vmem [shape: bf16[2,4,8,16], index: 1, kind: input, shape index: {}]   ;;  %s1140_s2 = inlined_call_operand.vmem [shape: bf16[2,4,8,16], index: 2, kind: input, shape index: {}]   ;;  %s1141_s3 = inlined_call_operand.vmem [shape: f32[8,8], index: 3, kind: input, shape index: {}]   ;;  %s1142_s4 = inlined_call_operand.vmem [shape: bf16[2,8,64], index: 4, kind: output, shape index: {}]  }
   0x1   :  { %s1005_s17 = smov 0  }
   0x2 LB: > { %s33_s18 = sadd.s32 1, %s964_s16  ;;  %p859_p0 = scmp.ge.s32.totalorder %s968_s17, 1  ;;  %s968_s17 = sphi %s1005_s17, %s14_s17   ;;  %s964_s16 = sphi %s1003_s16, %s1144_s16   ;;  %s960_s15 = sphi %s1001_s15, %s1143_s15  }
   0x3   : > { %p35_p1 = scmp.ge.s32.totalorder %s33_s18, 2  ;;  %p232_p2 = scmp.lt.s32.totalorder %s968_s17, 3 }
   0x5   : > { %s1146_s18 = smov (%p35_p1, %s33_s18), 0  ;;  %p233_p3 = pnand %p859_p0, %p232_p2 }
   0x6   : > { %p286_p4 = scmp.lt.s32.totalorder (!%p233_p3), %s960_s15, 1  ;;  %s973_s5 = smov (!%p233_p3), 32  }
   0x7   : > { %236 = sbr.rel (%p233_p3) target bundleno = 834 (0x342), region = 36  ;;  %s974_s6 = smov (!%p233_p3), 16  }
   0x8   : > { %s975_s7 = smov (!%p233_p3), 48  }
   0xc   : > { %s1148_s15 = smov (!%p286_p4, %s960_s15), 1  ;;  %vm338_vm0 = vcmask 130048   ;;  %vm329_vm1 = vcmask 7168   ;;  %v970_v20 = vmov -inf   ;;  %v367_v23 = vld [vmem:[%s1141_s3] sm:$0xff]  ;;  %vm449_vm2 = vcmask 64512  }
   0xd   : > { %s1022_s19 = sshll.u32 %s1148_s15, 4  ;;  %331 = vst.msk [vmem:[#allocation2 + $0x8] sm:$0xff] %vm329_vm1, %v970_v20  ;;  %v971_v36 = vmov 0   ;;  %v972_v37 = vmov 0.0   ;;  %vm574_vm3 = vcmask 1043456   ;;  %vm712_vm4 = vcmask 261120  }
   0xe   : > { %s301_s22 = scalar_lea.vmem %s1139_s1, %s1022_s19  ;;  %s293_s25 = scalar_lea.vmem %s1138_s0, %s1022_s19  ;;  %330 = vst.msk [vmem:[#allocation2] sm:$0xff] %vm329_vm1, %v970_v20  ;;  %921 = vset.pattern.permute.xlu0 %v971_v36  ;;  %919 = vset.pattern.permute.xlu1 %v971_v36  ;;  %vm714_vm5 = vcmask 392192   ;;  %vm717_vm6 = vcmask 519168  }
   0xf   : > { %v360_v0 = vld [vmem:[%s301_s22 + $0x4] sm:$0xf]  ;;  %v361_v1 = vld [vmem:[%s301_s22 + $0x8] sm:$0xf]  ;;  %v362_v2 = vld [vmem:[%s301_s22 + $0xc] sm:$0xf]  ;;  %920 = vset.pattern.permute.xlu2 %v971_v36  ;;  %s1088_s30 = scalar_lea.vmem %s1140_s2, %s1022_s19 }
  0x10   : > { %v392_v3 = vsel %vm338_vm0, %v360_v0, 0  ;;  %v411_v4 = vsel %vm338_vm0, %v361_v1, 0  ;;  %v430_v5 = vsel %vm338_vm0, %v362_v2, 0  ;;  %v881_v6 = vld [vmem:[%s293_s25] sm:$0xff]   ;;  %v888_v7 = vld [vmem:[%s293_s25 + $0x8] sm:$0xff]   ;;  %332 = vst.msk [vmem:[#allocation2 + $0x10] sm:$0xff] %vm329_vm1, %v970_v20 }
  0x11   : > { %401 = vmatpush.bf16.xpose.msra.mxu1 %v392_v3  ;;  %420 = vmatpush.bf16.xpose.msra.mxu2 %v411_v4  ;;  %v883_v8 = vunpack.c.h.bf16 %v881_v6  ;;  %v886_v9 = vunpack.c.l.bf16 %v888_v7  ;;  %v887_v10 = vunpack.c.h.bf16 %v888_v7  ;;  %v359_v17 = vld [vmem:[%s301_s22] sm:$0xf]  ;;  %v882_v18 = vunpack.c.l.bf16 %v881_v6  ;;  %333 = vst.msk [vmem:[#allocation2 + $0x18] sm:$0xff] %vm329_vm1, %v970_v20  ;;  %v366_v54 = vld [vmem:[%s1088_s30 + $0xc] sm:$0xf]  ;;  %s866_s8 = sshll.u32 %s1148_s15, 2 }
  0x12   : > { %439 = vmatpush.bf16.xpose.msra.mxu3 %v430_v5  ;;  %v373_v19 = vsel %vm338_vm0, %v359_v17, 0  ;;  %337 = vst.msk [vmem:[#allocation3 + $0x18] sm:$0xff] %vm329_vm1, %v972_v37  ;;  %v633_v55 = vsel %vm574_vm3, %v366_v54, 0  ;;  %v364_v56 = vld [vmem:[%s1088_s30 + $0x4] sm:$0xf]  ;;  %s323_s11 = scalar_lea.vmem %s1142_s4, %s866_s8 }
  0x13   : > { %v352_v11 = vmul.f32 0.25, %v883_v8  ;;  %v353_v12 = vmul.f32 0.25, %v886_v9  ;;  %v354_v13 = vmul.f32 0.25, %v887_v10  ;;  %382 = vmatpush.bf16.xpose.msra.mxu0 %v373_v19  ;;  %v351_v21 = vmul.f32 0.25, %v882_v18  ;;  %334 = vst.msk [vmem:[#allocation3] sm:$0xff] %vm329_vm1, %v972_v37 }
  0x14   : > { %335 = vst.msk [vmem:[#allocation3 + $0x8] sm:$0xff] %vm329_vm1, %v972_v37  ;;  %v1064_v38 = vld [vmem:[#allocation2 + $0x8] sm:$0xff]  ;;  %v595_v57 = vsel %vm574_vm3, %v364_v56, 0  ;;  %v363_v36 = vld [vmem:[%s1088_s30] sm:$0xf] }
  0x15   : > { %v356_v14 = vpack.c.bf16 %v352_v11, %v352_v11  ;;  %v357_v15 = vpack.c.bf16 %v353_v12, %v353_v12  ;;  %v358_v16 = vpack.c.bf16 %v354_v13, %v354_v13  ;;  %v355_v22 = vpack.c.bf16 %v351_v21, %v351_v21  ;;  %336 = vst.msk [vmem:[#allocation3 + $0x10] sm:$0xff] %vm329_vm1, %v972_v37  ;;  %v365_v58 = vld [vmem:[%s1088_s30 + $0x8] sm:$0xf]  ;;  %v445_v13 = vld [vmem:[#allocation2] sm:$0xff] }
  0x16   : > { %339 = vst.msk [vmem:[#allocation4] sm:$0xff] %vm338_vm0, %v972_v37  ;;  %v614_v59 = vsel %vm574_vm3, %v365_v58, 0 }
  0x17   : > { %340 = vst.msk [vmem:[#allocation4 + $0x8] sm:$0xff] %vm338_vm0, %v972_v37  ;;  %v1074_v43 = vld [vmem:[#allocation2 + $0x10] sm:$0xff] }
  0x18   : > { %868 = vmatmul.msk.bf16.vlgmr.msra.gmra.mxu1 %vm338_vm0, %v356_v14  ;;  %869 = vmatmul.msk.bf16.vlgmr.msra.gmra.mxu2 %vm338_vm0, %v357_v15  ;;  %341 = vst.msk [vmem:[#allocation4 + $0x10] sm:$0xff] %vm338_vm0, %v972_v37  ;;  %v448_v48 = vld [vmem:[#allocation2 + $0x18] sm:$0xff] }
  0x19   : > { %870 = vmatmul.msk.bf16.vlgmr.msra.gmra.mxu3 %vm338_vm0, %v358_v16  ;;  %342 = vst.msk [vmem:[#allocation4 + $0x18] sm:$0xff] %vm338_vm0, %v972_v37  ;;  %604 = vmatpush.bf16.msrb.mxu1 %v595_v57  ;;  %v513_v20 = vld [vmem:[#allocation3 + $0x18] sm:$0xff] }
  0x1a   : > { %867 = vmatmul.msk.bf16.vlgmr.msra.gmra.mxu0 %vm338_vm0, %v355_v22  ;;  %642 = vmatpush.bf16.msrb.mxu3 %v633_v55 }
  0x1b   : > { %623 = vmatpush.bf16.msrb.mxu2 %v614_v59  ;;  %v511_v54 = vld [vmem:[#allocation3 + $0x8] sm:$0xff] }
  0x95   : > { %v403_v24 = vpop.f32.mrf.mxu1 }
  0x96   : > { %v1047_v25 = vadd.f32 %v403_v24, %v367_v23 }
  0x97   : > { %v384_v41 = vpop.f32.mrf.mxu0 }
  0x98   : > { %v453_v26 = vsel %vm449_vm2, %v1047_v25, -inf  ;;  %v1080_v52 = vadd.f32 %v384_v41, %v367_v23 }
  0x99   : > { %454 = vmax.xlane.f32.xlu1 %v453_v26 }
  0x9a   : > { %v450_v53 = vsel %vm449_vm2, %v1080_v52, -inf }
  0x9b   : > { %v422_v27 = vpop.f32.mrf.mxu2 }
  0x9c   : > { %v1051_v28 = vadd.f32 %v422_v27, %v367_v23  ;;  %v441_v29 = vpop.f32.mrf.mxu3  ;;  %v512_v27 = vld [vmem:[#allocation3 + $0x10] sm:$0xff] }
  0x9d   : > { %v405_v30 = vpop.f32.mrf.mxu1  ;;  %v442_v32 = vadd.f32 %v441_v29, %v367_v23 }
  0x9e   : > { %v456_v31 = vsel %vm449_vm2, %v1051_v28, -inf }
  0x9f   : > { %457 = vmax.xlane.f32.xlu0 %v456_v31  ;;  %v459_v35 = vsel %vm449_vm2, %v442_v32, -inf  ;;  %v386_v47 = vpop.f32.mrf.mxu0 }
  0xa3   : > { %v424_v33 = vpop.f32.mrf.mxu2 }
  0xa4   : > { %v443_v34 = vpop.f32.mrf.mxu3 }
  0xa7   : > { %460 = vmax.xlane.f32.xlu0 %v459_v35 }
 0x10c   : > { %v455_v39 = vpop.xlane.xlu1 %454 }
 0x10d   : > { %v1067_v40 = vmax.f32 %v1064_v38, %v455_v39  ;;  %v576_v39 = vsel %vm574_vm3, %v363_v36, 0 }
 0x10e   : > { %585 = vmatpush.bf16.msrb.mxu0 %v576_v39 }
 0x10f   : > { %v467_v42 = vsub.f32 %v1064_v38, %v1067_v40  ;;  %657 = vst.msk [vmem:[#allocation2 + $0x8] sm:$0xff] %vm329_vm1, %v1067_v40  ;;  %485 = vperm.xlu0 %921, %v1067_v40  }
 0x112   : > { %v458_v44 = vpop.xlane.xlu0 %457 }
 0x113   : > { %v464_v45 = vmax.f32 %v1074_v43, %v458_v44 }
 0x115   : > { %v468_v46 = vsub.f32 %v1074_v43, %v464_v45  ;;  %658 = vst.msk [vmem:[#allocation2 + $0x10] sm:$0xff] %vm329_vm1, %v464_v45  ;;  %490 = vperm.xlu1 %919, %v464_v45  }
 0x117   : > { %v474_v21 = vmul.f32 1.442695, %v468_v46 }
 0x11a   : > { %v461_v49 = vpop.xlane.xlu0 %460 }
 0x11b   : > { %v465_v50 = vmax.f32 %v448_v48, %v461_v49 }
 0x11d   : > { %v469_v51 = vsub.f32 %v448_v48, %v465_v50  ;;  %659 = vst.msk [vmem:[#allocation2 + $0x18] sm:$0xff] %vm329_vm1, %v465_v50  ;;  %495 = vperm.xlu2 %920, %v465_v50  }
 0x11f   : > { %v476_v18 = vmul.f32 1.442695, %v469_v51  ;;  %v472_v51 = vmul.f32 1.442695, %v467_v42 }
 0x146   : > { %451 = vmax.xlane.f32.xlu2 %v450_v53 }
 0x177   : > { %v496_v60 = vpop.permute.xlu2 %495 }
 0x178   : > { %v501_v61 = vsub.f32 %v442_v32, %v496_v60  ;;  %v541_v60 = vld [vmem:[#allocation4 + $0x10] sm:$0xff] }
 0x17a   : > { %v508_v62 = vmul.f32 1.442695, %v501_v61 }
 0x17c   : > { %922 = vpow2.f32 %v508_v62 }
 0x181   : > { %v486_v63 = vpop.permute.xlu0 %485 }
 0x182   : > { %v923_v0 = vpop.eup %922  ;;  %v499_v1 = vsub.f32 %v1047_v25, %v486_v63 }
 0x183   : > { %v527_v2 = vsel %vm449_vm2, %v923_v0, 0.0  ;;  %v570_v3 = vpack.c.bf16 %v923_v0, %v923_v0 }
 0x184   : > { %v504_v4 = vmul.f32 1.442695, %v499_v1  ;;  %528 = vadd.xlane.f32.xlu0 %v527_v2  ;;  %v510_v1 = vld [vmem:[#allocation3] sm:$0xff] }
 0x185   : > { %874 = vmatmul.msk.bf16.vlgmr.msrb.gmra.mxu3 %vm449_vm2, %v570_v3 }
 0x186   : > { %924 = vpow2.f32 %v504_v4 }
 0x187   : > { %v491_v5 = vpop.permute.xlu1 %490 }
 0x188   : > { %v500_v6 = vsub.f32 %v1051_v28, %v491_v5  ;;  %v540_v5 = vld [vmem:[#allocation4 + $0x8] sm:$0xff] }
 0x18a   : > { %v506_v7 = vmul.f32 1.442695, %v500_v6  ;;  %v539_v6 = vld [vmem:[#allocation4] sm:$0xff] }
 0x18c   : > { %v925_v8 = vpop.eup %924  ;;  %926 = vpow2.f32 %v506_v7 }
 0x18d   : > { %v568_v9 = vpack.c.bf16 %v925_v8, %v925_v8  ;;  %v521_v17 = vsel %vm449_vm2, %v925_v8, 0.0  ;;  %928 = vpow2.f32 %v476_v18 }
 0x18e   : > { %930 = vpow2.f32 %v474_v21 }
 0x18f   : > { %872 = vmatmul.msk.bf16.vlgmr.msrb.gmra.mxu1 %vm449_vm2, %v568_v9 }
 0x192   : > { %v927_v10 = vpop.eup %926 }
 0x193   : > { %v524_v11 = vsel %vm449_vm2, %v927_v10, 0.0  ;;  %v569_v12 = vpack.c.bf16 %v927_v10, %v927_v10  ;;  %v929_v19 = vpop.eup %928 }
 0x194   : > { %525 = vadd.xlane.f32.xlu2 %v524_v11  ;;  %v517_v22 = vmul.f32 %v929_v19, %v513_v20  ;;  %v931_v26 = vpop.eup %930 }
 0x195   : > { %873 = vmatmul.msk.bf16.vlgmr.msrb.gmra.mxu2 %vm449_vm2, %v569_v12  ;;  %v516_v29 = vmul.f32 %v931_v26, %v512_v27 }
 0x1b9   : > { %v452_v14 = vpop.xlane.xlu2 %451 }
 0x1ba   : > { %v462_v15 = vmax.f32 %v445_v13, %v452_v14 }
 0x1bc   : > { %v466_v16 = vsub.f32 %v445_v13, %v462_v15  ;;  %656 = vst.msk [vmem:[#allocation2] sm:$0xff] %vm329_vm1, %v462_v15  ;;  %480 = vperm.xlu1 %919, %v462_v15   ;;  %v542_v15 = vld [vmem:[#allocation4 + $0x18] sm:$0xff] }
 0x1be   : > { %v470_v25 = vmul.f32 1.442695, %v466_v16 }
 0x1c0   : > { %932 = vpow2.f32 %v470_v25 }
 0x1c6   : > { %v933_v28 = vpop.eup %932 }
 0x1c7   : > { %v514_v2 = vmul.f32 %v933_v28, %v510_v1 }
 0x1e6   : > { %522 = vadd.xlane.f32.xlu1 %v521_v17 }
 0x1f7   : > { %v529_v23 = vpop.xlane.xlu0 %528 }
 0x1f8   : > { %v533_v24 = vadd.f32 %v529_v23, %v517_v22 }
 0x1fa   : > { %538 = vst.msk [vmem:[#allocation3 + $0x18] sm:$0xff] %vm329_vm1, %v533_v24 }
 0x1ff   : > { %555 = vperm.xlu1 %919, %v931_v26  }
 0x201   : > { %v670_v58 = vld [vmem:[#allocation3 + $0x18] sm:$0xff] }
 0x207   : > { %545 = vperm.xlu1 %919, %v933_v28   ;;  %v526_v30 = vpop.xlane.xlu2 %525 }
 0x208   : > { %v532_v31 = vadd.f32 %v526_v30, %v516_v29  ;;  %v1106_v32 = vpop.f32.mrf.mxu3 }
 0x20a   : > { %537 = vst.msk [vmem:[#allocation3 + $0x10] sm:$0xff] %vm329_vm1, %v532_v31 }
 0x20c   : > { %v606_v33 = vpop.f32.mrf.mxu1 }
 0x210   : > { %v646_v34 = vpop.f32.mrf.mxu3 }
 0x211   : > { %v669_v35 = vld [vmem:[#allocation3 + $0x10] sm:$0xff] }
 0x212   : > { %934 = vrcp.f32 %v669_v35 }
 0x214   : > { %v608_v37 = vpop.f32.mrf.mxu1 }
 0x218   : > { %v935_v41 = vpop.eup %934  ;;  %v625_v43 = vpop.f32.mrf.mxu2 }
 0x219   : > { %687 = vperm.xlu0 %921, %v935_v41  }
 0x220   : > { %v627_v44 = vpop.f32.mrf.mxu2 }
 0x22e   : > { %v481_v45 = vpop.permute.xlu1 %480 }
 0x22f   : > { %v498_v46 = vsub.f32 %v1080_v52, %v481_v45 }
 0x231   : > { %v502_v47 = vmul.f32 1.442695, %v498_v46 }
 0x233   : > { %936 = vpow2.f32 %v502_v47 }
 0x234   : > { %938 = vpow2.f32 %v472_v51 }
 0x239   : > { %v937_v48 = vpop.eup %936 }
 0x23a   : > { %v518_v49 = vsel %vm449_vm2, %v937_v48, 0.0  ;;  %v567_v50 = vpack.c.bf16 %v937_v48, %v937_v48  ;;  %v939_v53 = vpop.eup %938 }
 0x23b   : > { %519 = vadd.xlane.f32.xlu2 %v518_v49  ;;  %v515_v55 = vmul.f32 %v939_v53, %v511_v54 }
 0x23c   : > { %871 = vmatmul.msk.bf16.vlgmr.msrb.gmra.mxu0 %vm449_vm2, %v567_v50 }
 0x253   : > { %550 = vperm.xlu2 %920, %v939_v53  }
 0x259   : > { %v523_v56 = vpop.xlane.xlu1 %522 }
 0x25a   : > { %v531_v52 = vadd.f32 %v523_v56, %v515_v55 }
 0x25b   : > { %560 = vperm.xlu2 %920, %v929_v19  }
 0x25c   : > { %536 = vst.msk [vmem:[#allocation3 + $0x8] sm:$0xff] %vm329_vm1, %v531_v52 }
 0x263   : > { %v668_v57 = vld [vmem:[#allocation3 + $0x8] sm:$0xff] }
 0x264   : > { %940 = vrcp.f32 %v668_v57 }
 0x265   : > { %942 = vrcp.f32 %v670_v58 }
 0x26a   : > { %v941_v59 = vpop.eup %940 }
 0x26b   : > { %682 = vperm.xlu2 %920, %v941_v59   ;;  %v943_v38 = vpop.eup %942 }
 0x271   : > { %v556_v61 = vpop.permute.xlu1 %555 }
 0x272   : > { %v565_v40 = vmul.f32 %v556_v61, %v541_v60 }
 0x273   : > { %692 = vperm.xlu2 %920, %v943_v38  }
 0x274   : > { %v650_v42 = vadd.f32 %v625_v43, %v565_v40 }
 0x276   : > { %654 = vst.msk [vmem:[#allocation4 + $0x10] sm:$0xff] %vm338_vm0, %v650_v42 }
 0x279   : > { %v546_v7 = vpop.permute.xlu1 %545 }
 0x27a   : > { %v563_v10 = vmul.f32 %v546_v7, %v539_v6 }
 0x27d   : > { %v665_v62 = vld [vmem:[#allocation4 + $0x10] sm:$0xff] }
 0x28b   : > { %v688_v63 = vpop.permute.xlu0 %687 }
 0x28c   : > { %v697_v0 = vmul.f32 %v688_v63, %v665_v62 }
 0x28e   : > { %704 = vrot.lane.b32.xlu0 %v697_v0, %s973_s5 }
 0x2ae   : > { %v520_v3 = vpop.xlane.xlu2 %519 }
 0x2af   : > { %v530_v4 = vadd.f32 %v520_v3, %v514_v2 }
 0x2b1   : > { %535 = vst.msk [vmem:[#allocation3] sm:$0xff] %vm329_vm1, %v530_v4 }
 0x2b6   : > { %v551_v8 = vpop.permute.xlu2 %550 }
 0x2b7   : > { %v564_v9 = vmul.f32 %v551_v8, %v540_v5 }
 0x2b8   : > { %v667_v11 = vld [vmem:[#allocation3] sm:$0xff] }
 0x2b9   : > { %v649_v12 = vadd.f32 %v606_v33, %v564_v9  ;;  %v587_v13 = vpop.f32.mrf.mxu0  ;;  %944 = vrcp.f32 %v667_v11 }
 0x2ba   : > { %v648_v14 = vadd.f32 %v587_v13, %v563_v10 }
 0x2bb   : > { %653 = vst.msk [vmem:[#allocation4 + $0x8] sm:$0xff] %vm338_vm0, %v649_v12 }
 0x2bc   : > { %652 = vst.msk [vmem:[#allocation4] sm:$0xff] %vm338_vm0, %v648_v14 }
 0x2be   : > { %v561_v16 = vpop.permute.xlu2 %560 }
 0x2bf   : > { %v945_v17 = vpop.eup %944  ;;  %v566_v18 = vmul.f32 %v561_v16, %v542_v15 }
 0x2c0   : > { %677 = vperm.xlu2 %920, %v945_v17  }
 0x2c1   : > { %v651_v19 = vadd.f32 %v1106_v32, %v566_v18  ;;  %v589_v20 = vpop.f32.mrf.mxu0 }
 0x2c2   : > { %v664_v21 = vld [vmem:[#allocation4 + $0x8] sm:$0xff] }
 0x2c3   : > { %655 = vst.msk [vmem:[#allocation4 + $0x18] sm:$0xff] %vm338_vm0, %v651_v19  ;;  %v663_v28 = vld [vmem:[#allocation4] sm:$0xff] }
 0x2c6   : > { %v683_v22 = vpop.permute.xlu2 %682 }
 0x2c7   : > { %v696_v23 = vmul.f32 %v683_v22, %v664_v21 }
 0x2c9   : > { %700 = vrot.lane.b32.xlu1 %v696_v23, %s974_s6 }
 0x2ca   : > { %v666_v24 = vld [vmem:[#allocation4 + $0x18] sm:$0xff] }
 0x2ce   : > { %v693_v25 = vpop.permute.xlu2 %692 }
 0x2cf   : > { %v698_v26 = vmul.f32 %v693_v25, %v666_v24 }
 0x2d1   : > { %708 = vrot.lane.b32.xlu2 %v698_v26, %s975_s7 }
 0x300   : > { %v705_v31 = vpop.permute.xlu0 %704 }
 0x31a   : > { %v678_v27 = vpop.permute.xlu2 %677 }
 0x31b   : > { %v695_v29 = vmul.f32 %v678_v27, %v663_v28 }
 0x32b   : > { %v709_v33 = vpop.permute.xlu2 %708 }
 0x33b   : > { %v701_v30 = vpop.permute.xlu1 %700 }
 0x33c   : > { %v711_v32 = vsel %vm338_vm0, %v695_v29, %v701_v30 }
 0x33d   : > { %v713_v34 = vsel %vm712_vm4, %v711_v32, %v705_v31 }
 0x33e   : > { %v715_v35 = vsel %vm714_vm5, %v713_v34, %v709_v33 }
 0x33f   : > { %v716_v36 = vpack.c.bf16 %v715_v35, %v715_v35 }
 0x341   : > { %718 = vst.msk [vmem:[%s323_s11] sm:$0xf] %vm717_vm6, %v716_v36 }
 0x342 PF: > { %s14_s17 = sadd.s32 1, %s968_s17   ;;  %s1143_s15 = smov %s964_s16 }
 0x343   : > { %p11_p5 = scmp.ge.s32.totalorder %s14_s17, 4   ;;  %s1144_s16 = smov %s1146_s18 }
 0x345   :  { %13 = sbr.rel (!%p11_p5) target bundleno = 2 (0x2), region = 83 }

// kernel: transformer_forward.43
= control target key start
LH: loop header
LB: loop body
LE: loop exit
PB: predicated region body
PF: predicated region fallthrough
CT: control target
= control target key end

     0   :  { %vm82_vm0 = vcmask 523264   ;;  %s278_s1 = inlined_call_operand.vmem [shape: bf16[64,256], index: 1, kind: input, shape index: {}]   ;;  %s279_s0 = inlined_call_operand.vmem [shape: bf16[16,64], index: 0, kind: input, shape index: {}]   ;;  %s280_s2 = inlined_call_operand.vmem [shape: f32[1,256], index: 2, kind: input, shape index: {}]   ;;  %s281_s3 = inlined_call_operand.vmem [shape: bf16[16,256], index: 3, kind: output, shape index: {}]  }
   0x1   :  { %v181_v0 = vld [vmem:[%s278_s1 + $0x30] sm:$0xf]  ;;  %v197_v1 = vld [vmem:[%s278_s1 + $0x34] sm:$0xf0]  ;;  %v196_v2 = vld [vmem:[%s278_s1 + $0x34] sm:$0xf] }
   0x2   :  { %v182_v3 = vor.u32 %v197_v1, %v181_v0  ;;  %v183_v4 = vld [vmem:[%s278_s1 + $0x38] sm:$0xf0]  ;;  %v173_v5 = vld [vmem:[%s278_s1 + $0x20] sm:$0xf]  ;;  %v195_v6 = vld [vmem:[%s278_s1 + $0x24] sm:$0xf0] }
   0x3   :  { %v186_v7 = vor.u32 %v196_v2, %v183_v4  ;;  %v194_v8 = vld [vmem:[%s278_s1 + $0x24] sm:$0xf]  ;;  %v175_v9 = vld [vmem:[%s278_s1 + $0x28] sm:$0xf0]  ;;  %v174_v10 = vor.u32 %v195_v6, %v173_v5  ;;  %v165_v12 = vld [vmem:[%s278_s1 + $0x10] sm:$0xf] }
   0x4   :  { %90 = vmatpush.bf16.msra.mxu0 %v182_v3  ;;  %v178_v11 = vor.u32 %v194_v8, %v175_v9  ;;  %v193_v13 = vld [vmem:[%s278_s1 + $0x14] sm:$0xf0]  ;;  %v192_v14 = vld [vmem:[%s278_s1 + $0x14] sm:$0xf]  ;;  %v167_v15 = vld [vmem:[%s278_s1 + $0x18] sm:$0xf0] }
   0x5   :  { %104 = vmatpush.bf16.msra.mxu1 %v186_v7  ;;  %v166_v16 = vor.u32 %v193_v13, %v165_v12  ;;  %v170_v17 = vor.u32 %v192_v14, %v167_v15  ;;  %v157_v18 = vld [vmem:[%s278_s1] sm:$0xf]  ;;  %v191_v19 = vld [vmem:[%s278_s1 + $0x4] sm:$0xf0]  ;;  %v190_v20 = vld [vmem:[%s278_s1 + $0x4] sm:$0xf] }
   0x6   :  { %v159_v21 = vld [vmem:[%s278_s1 + $0x8] sm:$0xf0]  ;;  %v158_v22 = vor.u32 %v191_v19, %v157_v18  ;;  %v189_v24 = vld [vmem:[%s279_s0] sm:$0xff] }
   0x7   :  { %v162_v23 = vor.u32 %v190_v20, %v159_v21  ;;  %v129_v25 = vld [vmem:[%s280_s2] sm:$0x3] }
   0x8   :  { %91 = vmatpush.bf16.msra.mxu0 %v174_v10  ;;  %v131_v26 = vperm.slane %v129_v25, 0  ;;  %v132_v27 = vperm.slane %v129_v25, 1 }
   0x9   :  { %105 = vmatpush.bf16.msra.mxu1 %v178_v11 }
   0xc   :  { %92 = vmatpush.bf16.msra.mxu0 %v166_v16 }
   0xd   :  { %106 = vmatpush.bf16.msra.mxu1 %v170_v17 }
  0x10   :  { %93 = vmatpush.bf16.msra.mxu0 %v158_v22 }
  0x11   :  { %107 = vmatpush.bf16.msra.mxu1 %v162_v23 }
  0x13   :  { %187 = vmatmul.msk.bf16.vlgmr.msra.gmra.mxu0 %vm82_vm0, %v189_v24 }
  0x14   :  { %188 = vmatmul.msk.bf16.vlgmr.msra.gmra.mxu1 %vm82_vm0, %v189_v24 }
  0x90   :  { %v95_v28 = vpop.f32.mrf.mxu0 }
  0x91   :  { %v135_v29 = vadd.f32 %v131_v26, %v95_v28  ;;  %v109_v30 = vpop.f32.mrf.mxu1 }
  0x92   :  { %v136_v31 = vadd.f32 %v132_v27, %v109_v30 }
  0x93   :  { %v139_v32 = vmax.f32 %v135_v29, 0.0 }
  0x94   :  { %v140_v33 = vmax.f32 %v136_v31, 0.0 }
  0x96   :  { %v143_v34 = vpack.c.bf16 %v140_v33, %v139_v32 }
  0x98   :  { %145 = vst [vmem:[%s281_s3] sm:$0xff] %v143_v34  ;;  %v97_v35 = vpop.f32.mrf.mxu0 }
  0x99   :  { %v137_v36 = vadd.f32 %v131_v26, %v97_v35  ;;  %v111_v37 = vpop.f32.mrf.mxu1 }
  0x9a   :  { %v138_v38 = vadd.f32 %v132_v27, %v111_v37 }
  0x9b   :  { %v141_v39 = vmax.f32 %v137_v36, 0.0 }
  0x9c   :  { %v142_v40 = vmax.f32 %v138_v38, 0.0 }
  0x9e   :  { %v144_v41 = vpack.c.bf16 %v142_v40, %v141_v39 }
  0xa0   :  { %146 = vst [vmem:[%s281_s3 + $0x8] sm:$0xff] %v144_v41 }

// kernel: transformer_forward.40
= control target key start
LH: loop header
LB: loop body
LE: loop exit
PB: predicated region body
PF: predicated region fallthrough
CT: control target
= control target key end

     0   :  { %s920_s12 = smov 0   ;;  %s922_s13 = smov 0   ;;  %s1054_s0 = inlined_call_operand.vmem [shape: bf16[2,4,8,16], index: 0, kind: input, shape index: {}]   ;;  %s1055_s1 = inlined_call_operand.vmem [shape: bf16[2,4,8,16], index: 1, kind: input, shape index: {}]   ;;  %s1056_s2 = inlined_call_operand.vmem [shape: bf16[2,4,8,16], index: 2, kind: input, shape index: {}]   ;;  %s1057_s3 = inlined_call_operand.vmem [shape: bf16[2,8,64], index: 3, kind: output, shape index: {}]  }
   0x1   :  { %s924_s14 = smov 0  }
   0x2 LB: > { %s32_s15 = sadd.s32 1, %s888_s13  ;;  %p783_p0 = scmp.ge.s32.totalorder %s892_s14, 1  ;;  %s892_s14 = sphi %s924_s14, %s13_s14   ;;  %s888_s13 = sphi %s922_s13, %s1059_s13   ;;  %s884_s12 = sphi %s920_s12, %s1058_s12  }
   0x3   : > { %p34_p1 = scmp.ge.s32.totalorder %s32_s15, 2  ;;  %p193_p2 = scmp.lt.s32.totalorder %s892_s14, 3 }
   0x5   : > { %s1061_s15 = smov (%p34_p1, %s32_s15), 0  ;;  %p194_p3 = pnand %p783_p0, %p193_p2 }
   0x6   : > { %p238_p4 = scmp.lt.s32.totalorder (!%p194_p3), %s884_s12, 1  ;;  %s897_s26 = smov (!%p194_p3), 32  }
   0x7   : > { %197 = sbr.rel (%p194_p3) target bundleno = 832 (0x340), region = 32  ;;  %s898_s27 = smov (!%p194_p3), 16  }
   0x8   : > { %s899_s28 = smov (!%p194_p3), 48  }
   0xc   : > { %s1063_s12 = smov (!%p238_p4, %s884_s12), 1  ;;  %vm283_vm0 = vcmask 130048   ;;  %vm274_vm1 = vcmask 7168   ;;  %v894_v20 = vmov -inf   ;;  %vm393_vm2 = vcmask 64512  }
   0xd   : > { %s941_s16 = sshll.u32 %s1063_s12, 4  ;;  %276 = vst.msk [vmem:[#allocation2 + $0x8] sm:$0xff] %vm274_vm1, %v894_v20  ;;  %v895_v32 = vmov 0   ;;  %v896_v33 = vmov 0.0   ;;  %vm518_vm3 = vcmask 1043456   ;;  %vm656_vm4 = vcmask 261120  }
   0xe   : > { %s253_s19 = scalar_lea.vmem %s1055_s1, %s941_s16  ;;  %s245_s22 = scalar_lea.vmem %s1054_s0, %s941_s16  ;;  %275 = vst.msk [vmem:[#allocation2] sm:$0xff] %vm274_vm1, %v894_v20  ;;  %845 = vset.pattern.permute.xlu0 %v895_v32  ;;  %843 = vset.pattern.permute.xlu1 %v895_v32  ;;  %vm658_vm5 = vcmask 392192   ;;  %vm661_vm6 = vcmask 519168  }
   0xf   : > { %v305_v0 = vld [vmem:[%s253_s19 + $0x4] sm:$0xf]  ;;  %v306_v1 = vld [vmem:[%s253_s19 + $0x8] sm:$0xf]  ;;  %v307_v2 = vld [vmem:[%s253_s19 + $0xc] sm:$0xf]  ;;  %844 = vset.pattern.permute.xlu2 %v895_v32  ;;  %s1004_s25 = scalar_lea.vmem %s1056_s2, %s941_s16 }
  0x10   : > { %v336_v3 = vsel %vm283_vm0, %v305_v0, 0  ;;  %v355_v4 = vsel %vm283_vm0, %v306_v1, 0  ;;  %v374_v5 = vsel %vm283_vm0, %v307_v2, 0  ;;  %v805_v6 = vld [vmem:[%s245_s22] sm:$0xff]   ;;  %v812_v7 = vld [vmem:[%s245_s22 + $0x8] sm:$0xff]   ;;  %277 = vst.msk [vmem:[#allocation2 + $0x10] sm:$0xff] %vm274_vm1, %v894_v20 }
  0x11   : > { %345 = vmatpush.bf16.xpose.msra.mxu1 %v336_v3  ;;  %364 = vmatpush.bf16.xpose.msra.mxu2 %v355_v4  ;;  %v807_v8 = vunpack.c.h.bf16 %v805_v6  ;;  %v810_v9 = vunpack.c.l.bf16 %v812_v7  ;;  %v811_v10 = vunpack.c.h.bf16 %v812_v7  ;;  %v304_v17 = vld [vmem:[%s253_s19] sm:$0xf]  ;;  %v806_v18 = vunpack.c.l.bf16 %v805_v6  ;;  %278 = vst.msk [vmem:[#allocation2 + $0x18] sm:$0xff] %vm274_vm1, %v894_v20  ;;  %v311_v49 = vld [vmem:[%s1004_s25 + $0xc] sm:$0xf]  ;;  %s790_s29 = sshll.u32 %s1063_s12, 2 }
  0x12   : > { %383 = vmatpush.bf16.xpose.msra.mxu3 %v374_v5  ;;  %v317_v19 = vsel %vm283_vm0, %v304_v17, 0  ;;  %282 = vst.msk [vmem:[#allocation3 + $0x18] sm:$0xff] %vm274_vm1, %v896_v33  ;;  %v577_v50 = vsel %vm518_vm3, %v311_v49, 0  ;;  %v309_v51 = vld [vmem:[%s1004_s25 + $0x4] sm:$0xf]  ;;  %s268_s5 = scalar_lea.vmem %s1057_s3, %s790_s29 }
  0x13   : > { %v297_v11 = vmul.f32 0.25, %v807_v8  ;;  %v298_v12 = vmul.f32 0.25, %v810_v9  ;;  %v299_v13 = vmul.f32 0.25, %v811_v10  ;;  %326 = vmatpush.bf16.xpose.msra.mxu0 %v317_v19  ;;  %v296_v21 = vmul.f32 0.25, %v806_v18  ;;  %279 = vst.msk [vmem:[#allocation3] sm:$0xff] %vm274_vm1, %v896_v33 }
  0x14   : > { %280 = vst.msk [vmem:[#allocation3 + $0x8] sm:$0xff] %vm274_vm1, %v896_v33  ;;  %v980_v34 = vld [vmem:[#allocation2 + $0x8] sm:$0xff]  ;;  %v539_v52 = vsel %vm518_vm3, %v309_v51, 0 }
  0x15   : > { %v301_v14 = vpack.c.bf16 %v297_v11, %v297_v11  ;;  %v302_v15 = vpack.c.bf16 %v298_v12, %v298_v12  ;;  %v303_v16 = vpack.c.bf16 %v299_v13, %v299_v13  ;;  %v300_v22 = vpack.c.bf16 %v296_v21, %v296_v21  ;;  %281 = vst.msk [vmem:[#allocation3 + $0x10] sm:$0xff] %vm274_vm1, %v896_v33  ;;  %v310_v53 = vld [vmem:[%s1004_s25 + $0x8] sm:$0xf]  ;;  %v389_v8 = vld [vmem:[#allocation2] sm:$0xff] }
  0x16   : > { %284 = vst.msk [vmem:[#allocation4] sm:$0xff] %vm283_vm0, %v896_v33  ;;  %v558_v54 = vsel %vm518_vm3, %v310_v53, 0 }
  0x17   : > { %285 = vst.msk [vmem:[#allocation4 + $0x8] sm:$0xff] %vm283_vm0, %v896_v33  ;;  %v992_v39 = vld [vmem:[#allocation2 + $0x10] sm:$0xff] }
  0x18   : > { %792 = vmatmul.msk.bf16.vlgmr.msra.gmra.mxu1 %vm283_vm0, %v301_v14  ;;  %793 = vmatmul.msk.bf16.vlgmr.msra.gmra.mxu2 %vm283_vm0, %v302_v15  ;;  %286 = vst.msk [vmem:[#allocation4 + $0x10] sm:$0xff] %vm283_vm0, %v896_v33  ;;  %v392_v44 = vld [vmem:[#allocation2 + $0x18] sm:$0xff] }
  0x19   : > { %794 = vmatmul.msk.bf16.vlgmr.msra.gmra.mxu3 %vm283_vm0, %v303_v16  ;;  %287 = vst.msk [vmem:[#allocation4 + $0x18] sm:$0xff] %vm283_vm0, %v896_v33  ;;  %548 = vmatpush.bf16.msrb.mxu1 %v539_v52  ;;  %v457_v15 = vld [vmem:[#allocation3 + $0x18] sm:$0xff] }
  0x1a   : > { %791 = vmatmul.msk.bf16.vlgmr.msra.gmra.mxu0 %vm283_vm0, %v300_v22  ;;  %586 = vmatpush.bf16.msrb.mxu3 %v577_v50 }
  0x1b   : > { %567 = vmatpush.bf16.msrb.mxu2 %v558_v54  ;;  %v455_v49 = vld [vmem:[#allocation3 + $0x8] sm:$0xff] }
  0x1c   : > { %v456_v22 = vld [vmem:[#allocation3 + $0x10] sm:$0xff] }
  0x95   : > { %v963_v23 = vpop.f32.mrf.mxu1 }
  0x96   : > { %v397_v24 = vsel %vm393_vm2, %v963_v23, -inf }
  0x97   : > { %398 = vmax.xlane.f32.xlu1 %v397_v24  ;;  %v985_v37 = vpop.f32.mrf.mxu0 }
  0x98   : > { %v394_v48 = vsel %vm393_vm2, %v985_v37, -inf }
  0x9b   : > { %v967_v25 = vpop.f32.mrf.mxu2 }
  0x9c   : > { %v385_v26 = vpop.f32.mrf.mxu3  ;;  %v400_v27 = vsel %vm393_vm2, %v967_v25, -inf }
  0x9d   : > { %401 = vmax.xlane.f32.xlu0 %v400_v27  ;;  %v349_v28 = vpop.f32.mrf.mxu1  ;;  %v403_v29 = vsel %vm393_vm2, %v385_v26, -inf }
  0x9f   : > { %v330_v43 = vpop.f32.mrf.mxu0 }
  0xa3   : > { %v368_v30 = vpop.f32.mrf.mxu2 }
  0xa4   : > { %v387_v31 = vpop.f32.mrf.mxu3 }
  0xa5   : > { %404 = vmax.xlane.f32.xlu0 %v403_v29  ;;  %v308_v31 = vld [vmem:[%s1004_s25] sm:$0xf] }
  0xa6   : > { %v520_v33 = vsel %vm518_vm3, %v308_v31, 0 }
  0xa7   : > { %529 = vmatpush.bf16.msrb.mxu0 %v520_v33 }
 0x10a   : > { %v399_v35 = vpop.xlane.xlu1 %398 }
 0x10b   : > { %v983_v36 = vmax.f32 %v980_v34, %v399_v35 }
 0x10d   : > { %v411_v38 = vsub.f32 %v980_v34, %v983_v36  ;;  %601 = vst.msk [vmem:[#allocation2 + $0x8] sm:$0xff] %vm274_vm1, %v983_v36  ;;  %429 = vperm.xlu0 %845, %v983_v36  }
 0x110   : > { %v402_v40 = vpop.xlane.xlu0 %401 }
 0x111   : > { %v408_v41 = vmax.f32 %v992_v39, %v402_v40 }
 0x113   : > { %v412_v42 = vsub.f32 %v992_v39, %v408_v41  ;;  %602 = vst.msk [vmem:[#allocation2 + $0x10] sm:$0xff] %vm274_vm1, %v408_v41  ;;  %434 = vperm.xlu1 %843, %v408_v41  }
 0x115   : > { %v418_v16 = vmul.f32 1.442695, %v412_v42 }
 0x118   : > { %v405_v45 = vpop.xlane.xlu0 %404 }
 0x119   : > { %v409_v46 = vmax.f32 %v392_v44, %v405_v45 }
 0x11b   : > { %v413_v47 = vsub.f32 %v392_v44, %v409_v46  ;;  %603 = vst.msk [vmem:[#allocation2 + $0x18] sm:$0xff] %vm274_vm1, %v409_v46  ;;  %439 = vperm.xlu2 %844, %v409_v46  }
 0x11d   : > { %v420_v13 = vmul.f32 1.442695, %v413_v47  ;;  %v416_v47 = vmul.f32 1.442695, %v411_v38 }
 0x144   : > { %395 = vmax.xlane.f32.xlu2 %v394_v48 }
 0x175   : > { %v440_v55 = vpop.permute.xlu2 %439 }
 0x176   : > { %v445_v56 = vsub.f32 %v385_v26, %v440_v55  ;;  %v485_v55 = vld [vmem:[#allocation4 + $0x10] sm:$0xff] }
 0x178   : > { %v452_v57 = vmul.f32 1.442695, %v445_v56 }
 0x17a   : > { %846 = vpow2.f32 %v452_v57 }
 0x17f   : > { %v430_v58 = vpop.permute.xlu0 %429 }
 0x180   : > { %v847_v59 = vpop.eup %846  ;;  %v443_v60 = vsub.f32 %v963_v23, %v430_v58 }
 0x181   : > { %v471_v61 = vsel %vm393_vm2, %v847_v59, 0.0  ;;  %v514_v62 = vpack.c.bf16 %v847_v59, %v847_v59 }
 0x182   : > { %v448_v63 = vmul.f32 1.442695, %v443_v60  ;;  %472 = vadd.xlane.f32.xlu0 %v471_v61  ;;  %v454_v60 = vld [vmem:[#allocation3] sm:$0xff] }
 0x183   : > { %798 = vmatmul.msk.bf16.vlgmr.msrb.gmra.mxu3 %vm393_vm2, %v514_v62 }
 0x184   : > { %848 = vpow2.f32 %v448_v63 }
 0x185   : > { %v435_v0 = vpop.permute.xlu1 %434 }
 0x186   : > { %v444_v1 = vsub.f32 %v967_v25, %v435_v0  ;;  %v484_v0 = vld [vmem:[#allocation4 + $0x8] sm:$0xff] }
 0x188   : > { %v450_v2 = vmul.f32 1.442695, %v444_v1  ;;  %v483_v1 = vld [vmem:[#allocation4] sm:$0xff] }
 0x18a   : > { %v849_v3 = vpop.eup %848  ;;  %850 = vpow2.f32 %v450_v2 }
 0x18b   : > { %v512_v4 = vpack.c.bf16 %v849_v3, %v849_v3  ;;  %v465_v12 = vsel %vm393_vm2, %v849_v3, 0.0  ;;  %852 = vpow2.f32 %v420_v13 }
 0x18c   : > { %854 = vpow2.f32 %v418_v16 }
 0x18d   : > { %796 = vmatmul.msk.bf16.vlgmr.msrb.gmra.mxu1 %vm393_vm2, %v512_v4 }
 0x190   : > { %v851_v5 = vpop.eup %850 }
 0x191   : > { %v468_v6 = vsel %vm393_vm2, %v851_v5, 0.0  ;;  %v513_v7 = vpack.c.bf16 %v851_v5, %v851_v5  ;;  %v853_v14 = vpop.eup %852 }
 0x192   : > { %469 = vadd.xlane.f32.xlu2 %v468_v6  ;;  %v461_v17 = vmul.f32 %v853_v14, %v457_v15  ;;  %v855_v21 = vpop.eup %854 }
 0x193   : > { %797 = vmatmul.msk.bf16.vlgmr.msrb.gmra.mxu2 %vm393_vm2, %v513_v7  ;;  %v460_v24 = vmul.f32 %v855_v21, %v456_v22 }
 0x1b7   : > { %v396_v9 = vpop.xlane.xlu2 %395 }
 0x1b8   : > { %v406_v10 = vmax.f32 %v389_v8, %v396_v9 }
 0x1ba   : > { %v410_v11 = vsub.f32 %v389_v8, %v406_v10  ;;  %600 = vst.msk [vmem:[#allocation2] sm:$0xff] %vm274_vm1, %v406_v10  ;;  %424 = vperm.xlu1 %843, %v406_v10   ;;  %v486_v10 = vld [vmem:[#allocation4 + $0x18] sm:$0xff] }
 0x1bc   : > { %v414_v20 = vmul.f32 1.442695, %v410_v11 }
 0x1be   : > { %856 = vpow2.f32 %v414_v20 }
 0x1c4   : > { %v857_v23 = vpop.eup %856 }
 0x1c5   : > { %v458_v61 = vmul.f32 %v857_v23, %v454_v60 }
 0x1e4   : > { %466 = vadd.xlane.f32.xlu1 %v465_v12 }
 0x1f5   : > { %v473_v18 = vpop.xlane.xlu0 %472 }
 0x1f6   : > { %v477_v19 = vadd.f32 %v473_v18, %v461_v17 }
 0x1f8   : > { %482 = vst.msk [vmem:[#allocation3 + $0x18] sm:$0xff] %vm274_vm1, %v477_v19 }
 0x1fd   : > { %499 = vperm.xlu1 %843, %v855_v21  }
 0x1ff   : > { %v614_v53 = vld [vmem:[#allocation3 + $0x18] sm:$0xff] }
 0x205   : > { %489 = vperm.xlu1 %843, %v857_v23   ;;  %v470_v25 = vpop.xlane.xlu2 %469 }
 0x206   : > { %v476_v26 = vadd.f32 %v470_v25, %v460_v24  ;;  %v1022_v27 = vpop.f32.mrf.mxu3 }
 0x208   : > { %481 = vst.msk [vmem:[#allocation3 + $0x10] sm:$0xff] %vm274_vm1, %v476_v26 }
 0x20a   : > { %v550_v28 = vpop.f32.mrf.mxu1 }
 0x20e   : > { %v590_v29 = vpop.f32.mrf.mxu3 }
 0x20f   : > { %v613_v30 = vld [vmem:[#allocation3 + $0x10] sm:$0xff] }
 0x210   : > { %858 = vrcp.f32 %v613_v30 }
 0x212   : > { %v552_v32 = vpop.f32.mrf.mxu1 }
 0x216   : > { %v859_v35 = vpop.eup %858  ;;  %v569_v39 = vpop.f32.mrf.mxu2 }
 0x217   : > { %631 = vperm.xlu0 %845, %v859_v35  }
 0x21e   : > { %v571_v40 = vpop.f32.mrf.mxu2 }
 0x22c   : > { %v425_v41 = vpop.permute.xlu1 %424 }
 0x22d   : > { %v442_v42 = vsub.f32 %v985_v37, %v425_v41 }
 0x22f   : > { %v446_v43 = vmul.f32 1.442695, %v442_v42 }
 0x231   : > { %860 = vpow2.f32 %v446_v43 }
 0x232   : > { %862 = vpow2.f32 %v416_v47 }
 0x237   : > { %v861_v44 = vpop.eup %860 }
 0x238   : > { %v462_v45 = vsel %vm393_vm2, %v861_v44, 0.0  ;;  %v511_v46 = vpack.c.bf16 %v861_v44, %v861_v44  ;;  %v863_v48 = vpop.eup %862 }
 0x239   : > { %463 = vadd.xlane.f32.xlu2 %v462_v45  ;;  %v459_v50 = vmul.f32 %v863_v48, %v455_v49 }
 0x23a   : > { %795 = vmatmul.msk.bf16.vlgmr.msrb.gmra.mxu0 %vm393_vm2, %v511_v46 }
 0x251   : > { %494 = vperm.xlu2 %844, %v863_v48  }
 0x257   : > { %v467_v51 = vpop.xlane.xlu1 %466 }
 0x258   : > { %v475_v37 = vadd.f32 %v467_v51, %v459_v50 }
 0x259   : > { %504 = vperm.xlu2 %844, %v853_v14  }
 0x25a   : > { %480 = vst.msk [vmem:[#allocation3 + $0x8] sm:$0xff] %vm274_vm1, %v475_v37 }
 0x261   : > { %v612_v52 = vld [vmem:[#allocation3 + $0x8] sm:$0xff] }
 0x262   : > { %864 = vrcp.f32 %v612_v52 }
 0x263   : > { %866 = vrcp.f32 %v614_v53 }
 0x268   : > { %v865_v54 = vpop.eup %864 }
 0x269   : > { %626 = vperm.xlu2 %844, %v865_v54   ;;  %v867_v34 = vpop.eup %866 }
 0x26f   : > { %v500_v56 = vpop.permute.xlu1 %499 }
 0x270   : > { %v509_v36 = vmul.f32 %v500_v56, %v485_v55 }
 0x271   : > { %636 = vperm.xlu2 %844, %v867_v34  }
 0x272   : > { %v594_v38 = vadd.f32 %v569_v39, %v509_v36 }
 0x274   : > { %598 = vst.msk [vmem:[#allocation4 + $0x10] sm:$0xff] %vm283_vm0, %v594_v38 }
 0x277   : > { %v490_v2 = vpop.permute.xlu1 %489 }
 0x278   : > { %v507_v5 = vmul.f32 %v490_v2, %v483_v1 }
 0x27b   : > { %v609_v57 = vld [vmem:[#allocation4 + $0x10] sm:$0xff] }
 0x289   : > { %v632_v58 = vpop.permute.xlu0 %631 }
 0x28a   : > { %v641_v59 = vmul.f32 %v632_v58, %v609_v57 }
 0x28c   : > { %648 = vrot.lane.b32.xlu0 %v641_v59, %s897_s26 }
 0x2ac   : > { %v464_v62 = vpop.xlane.xlu2 %463 }
 0x2ad   : > { %v474_v63 = vadd.f32 %v464_v62, %v458_v61 }
 0x2af   : > { %479 = vst.msk [vmem:[#allocation3] sm:$0xff] %vm274_vm1, %v474_v63 }
 0x2b4   : > { %v495_v3 = vpop.permute.xlu2 %494 }
 0x2b5   : > { %v508_v4 = vmul.f32 %v495_v3, %v484_v0 }
 0x2b6   : > { %v611_v6 = vld [vmem:[#allocation3] sm:$0xff] }
 0x2b7   : > { %v593_v7 = vadd.f32 %v550_v28, %v508_v4  ;;  %v531_v8 = vpop.f32.mrf.mxu0  ;;  %868 = vrcp.f32 %v611_v6 }
 0x2b8   : > { %v592_v9 = vadd.f32 %v531_v8, %v507_v5 }
 0x2b9   : > { %597 = vst.msk [vmem:[#allocation4 + $0x8] sm:$0xff] %vm283_vm0, %v593_v7 }
 0x2ba   : > { %596 = vst.msk [vmem:[#allocation4] sm:$0xff] %vm283_vm0, %v592_v9 }
 0x2bc   : > { %v505_v11 = vpop.permute.xlu2 %504 }
 0x2bd   : > { %v869_v12 = vpop.eup %868  ;;  %v510_v13 = vmul.f32 %v505_v11, %v486_v10 }
 0x2be   : > { %621 = vperm.xlu2 %844, %v869_v12  }
 0x2bf   : > { %v595_v14 = vadd.f32 %v1022_v27, %v510_v13  ;;  %v533_v15 = vpop.f32.mrf.mxu0 }
 0x2c0   : > { %v608_v16 = vld [vmem:[#allocation4 + $0x8] sm:$0xff] }
 0x2c1   : > { %599 = vst.msk [vmem:[#allocation4 + $0x18] sm:$0xff] %vm283_vm0, %v595_v14  ;;  %v607_v23 = vld [vmem:[#allocation4] sm:$0xff] }
 0x2c4   : > { %v627_v17 = vpop.permute.xlu2 %626 }
 0x2c5   : > { %v640_v18 = vmul.f32 %v627_v17, %v608_v16 }
 0x2c7   : > { %644 = vrot.lane.b32.xlu1 %v640_v18, %s898_s27 }
 0x2c8   : > { %v610_v19 = vld [vmem:[#allocation4 + $0x18] sm:$0xff] }
 0x2cc   : > { %v637_v20 = vpop.permute.xlu2 %636 }
 0x2cd   : > { %v642_v21 = vmul.f32 %v637_v20, %v610_v19 }
 0x2cf   : > { %652 = vrot.lane.b32.xlu2 %v642_v21, %s899_s28 }
 0x2fe   : > { %v649_v26 = vpop.permute.xlu0 %648 }
 0x318   : > { %v622_v22 = vpop.permute.xlu2 %621 }
 0x319   : > { %v639_v24 = vmul.f32 %v622_v22, %v607_v23 }
 0x329   : > { %v653_v28 = vpop.permute.xlu2 %652 }
 0x339   : > { %v645_v25 = vpop.permute.xlu1 %644 }
 0x33a   : > { %v655_v27 = vsel %vm283_vm0, %v639_v24, %v645_v25 }
 0x33b   : > { %v657_v29 = vsel %vm656_vm4, %v655_v27, %v649_v26 }
 0x33c   : > { %v659_v30 = vsel %vm658_vm5, %v657_v29, %v653_v28 }
 0x33d   : > { %v660_v31 = vpack.c.bf16 %v659_v30, %v659_v30 }
 0x33f   : > { %662 = vst.msk [vmem:[%s268_s5] sm:$0xf] %vm661_vm6, %v660_v31 }
 0x340 PF: > { %s13_s14 = sadd.s32 1, %s892_s14   ;;  %s1058_s12 = smov %s888_s13 }
 0x341   : > { %p10_p5 = scmp.ge.s32.totalorder %s13_s14, 4   ;;  %s1059_s13 = smov %s1061_s15 }
 0x343   :  { %12 = sbr.rel (!%p10_p5) target bundleno = 2 (0x2), region = 76 }

// kernel: transformer_forward.44
= control target key start
LH: loop header
LB: loop body
LE: loop exit
PB: predicated region body
PF: predicated region fallthrough
CT: control target
= control target key end

     0   :  { %vm18_vm0 = vcmask 523264   ;;  %v308_v22 = vmov 0.0   ;;  %vm209_vm1 = vcmask 519168   ;;  %s402_s1 = inlined_call_operand.vmem [shape: bf16[256,64], index: 1, kind: input, shape index: {}]   ;;  %s403_s0 = inlined_call_operand.vmem [shape: bf16[16,256], index: 0, kind: input, shape index: {}]   ;;  %s404_s2 = inlined_call_operand.vmem [shape: f32[1,64], index: 2, kind: input, shape index: {}]   ;;  %s405_s3 = inlined_call_operand.vmem [shape: bf16[16,64], index: 3, kind: output, shape index: {}]  }
   0x1   :  { %v297_v0 = vld [vmem:[%s402_s1 + $0x38] sm:$0xff]  ;;  %v296_v2 = vld [vmem:[%s402_s1 + $0x30] sm:$0xff]  ;;  %v295_v4 = vld [vmem:[%s402_s1 + $0x28] sm:$0xff]  ;;  %19 = vst.msk [vmem:[#allocation2] sm:$0xff] %vm18_vm0, %v308_v22 }
   0x2   :  { %v305_v1 = vld [vmem:[%s402_s1 + $0x78] sm:$0xff]  ;;  %163 = vmatpush.bf16.msra.mxu0 %v297_v0  ;;  %v304_v3 = vld [vmem:[%s402_s1 + $0x70] sm:$0xff]  ;;  %v303_v5 = vld [vmem:[%s402_s1 + $0x68] sm:$0xff]  ;;  %20 = vst.msk [vmem:[#allocation2 + $0x8] sm:$0xff] %vm18_vm0, %v308_v22 }
   0x3   :  { %177 = vmatpush.bf16.msra.mxu1 %v305_v1  ;;  %v294_v6 = vld [vmem:[%s402_s1 + $0x20] sm:$0xff]  ;;  %v293_v8 = vld [vmem:[%s402_s1 + $0x18] sm:$0xff]  ;;  %v292_v10 = vld [vmem:[%s402_s1 + $0x10] sm:$0xff] }
   0x4   :  { %v302_v7 = vld [vmem:[%s402_s1 + $0x60] sm:$0xff]  ;;  %v301_v9 = vld [vmem:[%s402_s1 + $0x58] sm:$0xff]  ;;  %v300_v11 = vld [vmem:[%s402_s1 + $0x50] sm:$0xff] }
   0x5   :  { %v291_v12 = vld [vmem:[%s402_s1 + $0x8] sm:$0xff]  ;;  %v290_v14 = vld [vmem:[%s402_s1] sm:$0xff] }
   0x6   :  { %164 = vmatpush.bf16.msra.mxu0 %v296_v2  ;;  %v299_v13 = vld [vmem:[%s402_s1 + $0x48] sm:$0xff]  ;;  %v298_v15 = vld [vmem:[%s402_s1 + $0x40] sm:$0xff] }
   0x7   :  { %178 = vmatpush.bf16.msra.mxu1 %v304_v3  ;;  %v218_v16 = vld [vmem:[%s403_s0] sm:$0xf]  ;;  %v289_v17 = vld [vmem:[%s403_s0 + $0x4] sm:$0xf0]  ;;  %v288_v18 = vld [vmem:[%s403_s0 + $0x4] sm:$0xf] }
   0x8   :  { %v220_v19 = vld [vmem:[%s403_s0 + $0x8] sm:$0xf0]  ;;  %v219_v20 = vor.u32 %v289_v17, %v218_v16  ;;  %v21_v24 = vld [vmem:[#allocation2] sm:$0xff] }
   0x9   :  { %v223_v21 = vor.u32 %v288_v18, %v220_v19  ;;  %v22_v29 = vld [vmem:[#allocation2 + $0x8] sm:$0xff]  ;;  %v307_v31 = vld [vmem:[%s404_s2] ss:$0 sm:$0xff] }
   0xa   :  { %165 = vmatpush.bf16.msra.mxu0 %v295_v4 }
   0xb   :  { %179 = vmatpush.bf16.msra.mxu1 %v303_v5 }
   0xe   :  { %166 = vmatpush.bf16.msra.mxu0 %v294_v6 }
   0xf   :  { %180 = vmatpush.bf16.msra.mxu1 %v302_v7 }
  0x12   :  { %167 = vmatpush.bf16.msra.mxu0 %v293_v8 }
  0x13   :  { %181 = vmatpush.bf16.msra.mxu1 %v301_v9 }
  0x16   :  { %168 = vmatpush.bf16.msra.mxu0 %v292_v10 }
  0x17   :  { %182 = vmatpush.bf16.msra.mxu1 %v300_v11 }
  0x1a   :  { %169 = vmatpush.bf16.msra.mxu0 %v291_v12 }
  0x1b   :  { %183 = vmatpush.bf16.msra.mxu1 %v299_v13 }
  0x1e   :  { %170 = vmatpush.bf16.msra.mxu0 %v290_v14 }
  0x1f   :  { %184 = vmatpush.bf16.msra.mxu1 %v298_v15 }
  0x21   :  { %171 = vmatmul.bf16.vlgmr.msra.gmra.mxu0 %v219_v20 }
  0x22   :  { %185 = vmatmul.bf16.vlgmr.msra.gmra.mxu1 %v223_v21 }
  0x9e   :  { %v172_v23 = vpop.f32.mrf.mxu0 }
  0x9f   :  { %v186_v25 = vpop.f32.mrf.mxu1 }
  0xa0   :  { %v187_v26 = vadd.f32 %v186_v25, %v172_v23 }
  0xa2   :  { %v191_v27 = vadd.f32 %v187_v26, %v21_v24 }
  0xa4   :  { %194 = vst.msk [vmem:[#allocation2] sm:$0xff] %vm18_vm0, %v191_v27 }
  0xa6   :  { %v174_v28 = vpop.f32.mrf.mxu0 }
  0xa7   :  { %v188_v30 = vpop.f32.mrf.mxu1 }
  0xa8   :  { %v189_v32 = vadd.f32 %v188_v30, %v174_v28 }
  0xaa   :  { %v192_v33 = vadd.f32 %v189_v32, %v22_v29 }
  0xab   :  { %v199_v34 = vld [vmem:[#allocation2] sm:$0xff] }
  0xac   :  { %v205_v35 = vadd.f32 %v307_v31, %v199_v34  ;;  %195 = vst.msk [vmem:[#allocation2 + $0x8] sm:$0xff] %vm18_vm0, %v192_v33 }
  0xae   :  { %v207_v36 = vpack.c.bf16 %v205_v35, %v205_v35 }
  0xb0   :  { %210 = vst.msk [vmem:[%s405_s3] sm:$0xf] %vm209_vm1, %v207_v36 }
  0xb3   :  { %v200_v37 = vld [vmem:[#allocation2 + $0x8] sm:$0xff] }
  0xb4   :  { %v206_v38 = vadd.f32 %v307_v31, %v200_v37 }
  0xb6   :  { %v208_v39 = vpack.c.bf16 %v206_v38, %v206_v38 }
  0xb8   :  { %211 = vst.msk [vmem:[%s405_s3 + $0x4] sm:$0xf] %vm209_vm1, %v208_v39 }

// kernel: transformer_forward.58
= control target key start
LH: loop header
LB: loop body
LE: loop exit
PB: predicated region body
PF: predicated region fallthrough
CT: control target
= control target key end

     0   :  { %vm62_vm0 = vcmask 523264   ;;  %s176_s1 = inlined_call_operand.vmem [shape: bf16[64,128], index: 1, kind: input, shape index: {}]   ;;  %s177_s2 = inlined_call_operand.vmem [shape: f32[1,128], index: 2, kind: input, shape index: {}]   ;;  %s178_s0 = inlined_call_operand.vmem [shape: bf16[16,64], index: 0, kind: input, shape index: {}]   ;;  %s179_s3 = inlined_call_operand.vmem [shape: bf16[16,128], index: 3, kind: output, shape index: {}]  }
   0x1   :  { %v128_v0 = vld [vmem:[%s176_s1 + $0x18] sm:$0xff]  ;;  %v127_v1 = vld [vmem:[%s176_s1 + $0x10] sm:$0xff]  ;;  %v126_v2 = vld [vmem:[%s176_s1 + $0x8] sm:$0xff] }
   0x2   :  { %70 = vmatpush.bf16.msra.mxu0 %v128_v0  ;;  %v125_v3 = vld [vmem:[%s176_s1] sm:$0xff] }
   0x3   :  { %v124_v4 = vld [vmem:[%s178_s0] sm:$0xff] }
   0x4   :  { %v134_v6 = vld [vmem:[%s177_s2] ss:$0 sm:$0xff] }
   0x6   :  { %71 = vmatpush.bf16.msra.mxu0 %v127_v1 }
   0xa   :  { %72 = vmatpush.bf16.msra.mxu0 %v126_v2 }
   0xe   :  { %73 = vmatpush.bf16.msra.mxu0 %v125_v3 }
  0x11   :  { %123 = vmatmul.msk.bf16.vlgmr.msra.gmra.mxu0 %vm62_vm0, %v124_v4 }
  0x8e   :  { %v75_v5 = vpop.f32.mrf.mxu0 }
  0x8f   :  { %v93_v8 = vadd.f32 %v134_v6, %v75_v5 }
  0x96   :  { %v77_v7 = vpop.f32.mrf.mxu0 }
  0x97   :  { %v94_v9 = vadd.f32 %v134_v6, %v77_v7 }
  0x99   :  { %v132_v10 = vpack.c.bf16 %v94_v9, %v93_v8 }
  0x9b   :  { %133 = vst [vmem:[%s179_s3] sm:$0xff] %v132_v10  }

// kernel: transformer_forward.77
= control target key start
LH: loop header
LB: loop body
LE: loop exit
PB: predicated region body
PF: predicated region fallthrough
CT: control target
= control target key end

     0   :  { %s216_s0 = inlined_call_operand.vmem [shape: bf16[16,64], index: 0, kind: input, shape index: {}]   ;;  %s217_s1 = inlined_call_operand.vmem [shape: bf16[64,128], index: 1, kind: input, shape index: {}]   ;;  %s218_s2 = inlined_call_operand.vmem [shape: f32[1,128], index: 2, kind: input, shape index: {}]   ;;  %s219_s3 = inlined_call_operand.hbm [shape: f32[16,128], index: 3, kind: output, shape index: {}]  }
   0x1   :  { %v141_v0 = vld [vmem:[%s217_s1 + $0x18] sm:$0xff]  ;;  %v140_v1 = vld [vmem:[%s217_s1 + $0x10] sm:$0xff] }
   0x2   :  { %71 = vmatpush.bf16.msra.mxu0 %v141_v0 }
   0x3   :  { %8 = vsyncpa [#allocation4], 0  ;;  %v139_v2 = vld [vmem:[%s217_s1 + $0x8] sm:$0xff]  ;;  %v138_v3 = vld [vmem:[%s217_s1] sm:$0xff]  ;;  %vm63_vm0 = vcmask 523264   ;;  %s172_s24 = smov [#allocation3]  }
   0x4   :  { %v137_v4 = vld [vmem:[%s216_s0] sm:$0xff]  ;;  %s102_s25 = sshll.u32 %s172_s24, 4  ;;  %s104_s1 = sshll.u32 %s219_s3, 4  ;;  %s103_s25 = int_to_ptr.vmem [resolvable:$true] %s102_s25  ;;  %s105_s1 = int_to_ptr.hbm [resolvable:$true] %s104_s1 }
   0x5   :  { %v145_v5 = vld [vmem:[%s218_s2] ss:$0 sm:$0xff]  ;;  %s173_s0 = smov 128   ;;  %s174_s28 = smov 8  }
   0x6   :  { %72 = vmatpush.bf16.msra.mxu0 %v140_v1 }
   0xa   :  { %73 = vmatpush.bf16.msra.mxu0 %v139_v2 }
   0xe   :  { %74 = vmatpush.bf16.msra.mxu0 %v138_v3 }
  0x11   :  { %136 = vmatmul.msk.bf16.vlgmr.msra.gmra.mxu0 %vm63_vm0, %v137_v4 }
  0x8e   :  { %v76_v6 = vpop.f32.mrf.mxu0 }
  0x8f   :  { %v94_v7 = vadd.f32 %v145_v5, %v76_v6 }
  0x91   :  { %96 = vst [vmem:[#allocation3] sm:$0xff] %v94_v7 }
  0x96   :  { %v78_v8 = vpop.f32.mrf.mxu0 }
  0x97   :  { %v95_v9 = vadd.f32 %v145_v5, %v78_v8 }
  0x99   :  { %97 = vst [vmem:[#allocation3 + $0x8] sm:$0xff] %v95_v9 }
  0x9a   :  { %110 = dma.vmem_to_hbm [thread:$0]  %s103_s25, 256, %s105_s1, [#allocation4], %s173_s0, %s173_s0, %s174_s28  }
  0x9b   :  { %170 = dma.done.wait [#allocation4], 256  }
  0x9c   :  { %171 = vsyncadd [#allocation4], 4294967040 }
  0x9d   :  { %115 = vsyncpa [#allocation4], 1 }

</bundles_post_ra>
